<compile_context>
chip_gen: v5e
topology: v5e:2x2
jax: 0.10.0
libtpu: 0.0.40
codegen_flags: <defaults>
</compile_context>

<pallas_src>
import jax
import jax.numpy as jnp
from jax.experimental import pallas as pl
from jax.experimental.pallas import tpu as pltpu


def _make_lstm_decoder_kernel(num_layers, seq_len, hidden_size):
    """Builds the Pallas kernel.  Whole problem lives in VMEM (tiny shapes)."""
    H = hidden_size

    def kernel(*refs):
        # refs = x, w_ih0_T, w_hh0_T, b0, (w_cat_l, b_l) for l=1..L-1, out
        x_ref = refs[0]
        w_ih0_ref, w_hh0_ref, b0_ref = refs[1], refs[2], refs[3]
        layer_refs = refs[4:4 + 2 * (num_layers - 1)]
        out_ref = refs[4 + 2 * (num_layers - 1)]

        B = x_ref.shape[0]

        # ---- hoisted loads: issued once, live for the whole recurrence ----
        x = x_ref[...]                                             # (B, D)
        w_ih0 = w_ih0_ref[...]                                     # (D, 4H)
        w_hh0 = w_hh0_ref[...]                                     # (H, 4H)
        b0 = b0_ref[...]                                           # (1, 4H)
        w_cat = [layer_refs[2 * i][...] for i in range(num_layers - 1)]     # (2H, 4H)
        b_hi = [layer_refs[2 * i + 1][...] for i in range(num_layers - 1)]  # (1, 4H)

        # Layer-0 input contribution is identical at every timestep (the latent
        # is repeated), so compute it once, outside the recurrence.
        xg0 = jnp.dot(x, w_ih0, preferred_element_type=jnp.float32) + b0    # (B, 4H)

        hs = [jnp.zeros((B, H), jnp.float32) for _ in range(num_layers)]
        cs = [jnp.zeros((B, H), jnp.float32) for _ in range(num_layers)]

        def cell(pre, c_prev):
            # One full-width sigmoid + one full-width tanh (EUP), then static
            # gate slices.  PyTorch gate order along the 4H axis: i, f, g, o.
            sg = jax.nn.sigmoid(pre)
            th = jnp.tanh(pre)
            i = sg[:, 0 * H:1 * H]
            f = sg[:, 1 * H:2 * H]
            g = th[:, 2 * H:3 * H]
            o = sg[:, 3 * H:4 * H]
            c_new = f * c_prev + i * g
            h_new = o * jnp.tanh(c_new)
            return h_new, c_new

        # Fully unrolled timestep loop (seq_len static, state tiny) — same
        # effect as lax.fori_loop(..., unroll=True) but lets us collect the
        # per-step outputs for a single lane-dense final store.
        outs = []
        for _ in range(seq_len):
            # layer 0: only the recurrent matmul is inside the loop
            pre0 = xg0 + jnp.dot(hs[0], w_hh0,
                                 preferred_element_type=jnp.float32)
            hs[0], cs[0] = cell(pre0, cs[0])
            inp = hs[0]

            # higher layers: single fused K=2H matmul per layer/step
            for l in range(1, num_layers):
                xin = jnp.concatenate([inp, hs[l]], axis=-1)        # (B, 2H)
                pre = (jnp.dot(xin, w_cat[l - 1],
                               preferred_element_type=jnp.float32)
                       + b_hi[l - 1])
                hs[l], cs[l] = cell(pre, cs[l])
                inp = hs[l]
            outs.append(inp)

        # Single lane-dense (B, seq_len*H) store (8*32 = 256 lanes -> unmasked).
        out_ref[...] = jnp.concatenate(outs, axis=-1).astype(out_ref.dtype)

    return kernel


def lstm_decoder_forward(x, params, *, hidden_size, num_layers, seq_len):
    """params[l] = (w_ih (4H,in), w_hh (4H,H), b_ih (4H,), b_hh (4H,))."""
    B, _ = x.shape
    H = hidden_size

    w_ih0, w_hh0, b_ih0, b_hh0 = params[0]
    inputs = [
        x.astype(jnp.float32),
        jnp.asarray(w_ih0.T, jnp.float32),                       # (D, 4H)
        jnp.asarray(w_hh0.T, jnp.float32),                       # (H, 4H)
        (b_ih0 + b_hh0).reshape(1, -1).astype(jnp.float32),      # (1, 4H)
    ]
    for l in range(1, num_layers):
        w_ih, w_hh, b_ih, b_hh = params[l]
        # Fused [W_ih; W_hh] so each layer/step is a single K=2H matmul.
        w_cat = jnp.concatenate([jnp.asarray(w_ih.T, jnp.float32),
                                 jnp.asarray(w_hh.T, jnp.float32)],
                                axis=0)                           # (2H, 4H)
        inputs.append(w_cat)
        inputs.append((b_ih + b_hh).reshape(1, -1).astype(jnp.float32))

    kernel = _make_lstm_decoder_kernel(num_layers, seq_len, hidden_size)
    out_flat = pl.pallas_call(
        kernel,
        out_shape=jax.ShapeDtypeStruct((B, seq_len * H), jnp.float32),
        in_specs=[pl.BlockSpec(memory_space=pltpu.MemorySpace.VMEM)] * len(inputs),
        out_specs=pl.BlockSpec(memory_space=pltpu.MemorySpace.VMEM),
    )(*inputs)
    # Row-major reshape back to PyTorch batch_first (B, T, H): free, no
    # transpose kernel (replaces the old (T,B,H) output + XLA transpose).
    return out_flat.reshape(B, seq_len, H)


def init_lstm_params(key, input_size, hidden_size, num_layers):
    """Deterministic U(-1/sqrt(H), 1/sqrt(H)) init, mirroring nn.LSTM defaults."""
    k = 1.0 / float(hidden_size) ** 0.5
    params = []
    for l in range(num_layers):
        in_dim = input_size if l == 0 else hidden_size
        key, k1, k2, k3, k4 = jax.random.split(key, 5)
        w_ih = jax.random.uniform(k1, (4 * hidden_size, in_dim),
                                  minval=-k, maxval=k, dtype=jnp.float32)
        w_hh = jax.random.uniform(k2, (4 * hidden_size, hidden_size),
                                  minval=-k, maxval=k, dtype=jnp.float32)
        b_ih = jax.random.uniform(k3, (4 * hidden_size,),
                                  minval=-k, maxval=k, dtype=jnp.float32)
        b_hh = jax.random.uniform(k4, (4 * hidden_size,),
                                  minval=-k, maxval=k, dtype=jnp.float32)
        params.append((w_ih, w_hh, b_ih, b_hh))
    return params


def lstm_decoder_reference(x, params, hidden_size, num_layers, seq_len):
    """Pure-JAX reference implementing the PyTorch forward exactly."""
    B = x.shape[0]
    H = hidden_size
    hs = [jnp.zeros((B, H), jnp.float32) for _ in range(num_layers)]
    cs = [jnp.zeros((B, H), jnp.float32) for _ in range(num_layers)]
    outs = []
    for _ in range(seq_len):
        inp = x
        for l in range(num_layers):
            w_ih, w_hh, b_ih, b_hh = params[l]
            pre = inp @ w_ih.T + hs[l] @ w_hh.T + b_ih + b_hh
            i = jax.nn.sigmoid(pre[:, 0 * H:1 * H])
            f = jax.nn.sigmoid(pre[:, 1 * H:2 * H])
            g = jnp.tanh(pre[:, 2 * H:3 * H])
            o = jax.nn.sigmoid(pre[:, 3 * H:4 * H])
            cs[l] = f * cs[l] + i * g
            hs[l] = o * jnp.tanh(cs[l])
            inp = hs[l]
        outs.append(inp)
    return jnp.stack(outs, axis=1)  # (B, T, H)


if __name__ == "__main__":
    # layer_dim_list = [input_size, hidden_size, num_layers, seq_len]
    input_size, hidden_size, num_layers, seq_len = 4, 32, 2, 8
    batch = 2

    key = jax.random.PRNGKey(0)
    key, xkey = jax.random.split(key)
    x = jax.random.uniform(xkey, (batch, input_size), dtype=jnp.float32)
    params = init_lstm_params(key, input_size, hidden_size, num_layers)

    out = lstm_decoder_forward(x, params, hidden_size=hidden_size,
                               num_layers=num_layers, seq_len=seq_len)
    out = jax.block_until_ready(out)

    assert out.shape == (batch, seq_len, hidden_size), out.shape

    ref = lstm_decoder_reference(x, params, hidden_size, num_layers, seq_len)
    if not bool(jnp.allclose(out, ref, atol=1e-4, rtol=1e-4)):
        raise RuntimeError("Pallas LSTMDecoder output mismatch vs JAX reference")

    print("KERNEL_OK")
</pallas_src>

<mosaic_0001>
module attributes {stable_mosaic.version = 11 : i64} {
  func.func @kernel(%arg0: memref<2x4xf32, #tpu.memory_space<vmem>>, %arg1: memref<4x128xf32, #tpu.memory_space<vmem>>, %arg2: memref<32x128xf32, #tpu.memory_space<vmem>>, %arg3: memref<1x128xf32, #tpu.memory_space<vmem>>, %arg4: memref<64x128xf32, #tpu.memory_space<vmem>>, %arg5: memref<1x128xf32, #tpu.memory_space<vmem>>, %arg6: memref<2x256xf32, #tpu.memory_space<vmem>>) attributes {dimension_semantics = [], scalar_prefetch = 0 : i64, scratch_operands = 0 : i64, tpu.core_type = #tpu.core_type<tc>} {
    %c0 = arith.constant 0 : index
    %c0_0 = arith.constant 0 : index
    %0 = vector.load %arg0[%c0, %c0_0] : memref<2x4xf32, #tpu.memory_space<vmem>>, vector<2x4xf32>
    %c0_1 = arith.constant 0 : index
    %c0_2 = arith.constant 0 : index
    %1 = vector.load %arg1[%c0_1, %c0_2] : memref<4x128xf32, #tpu.memory_space<vmem>>, vector<4x128xf32>
    %c0_3 = arith.constant 0 : index
    %c0_4 = arith.constant 0 : index
    %2 = vector.load %arg2[%c0_3, %c0_4] : memref<32x128xf32, #tpu.memory_space<vmem>>, vector<32x128xf32>
    %c0_5 = arith.constant 0 : index
    %c0_6 = arith.constant 0 : index
    %3 = vector.load %arg3[%c0_5, %c0_6] : memref<1x128xf32, #tpu.memory_space<vmem>>, vector<1x128xf32>
    %c0_7 = arith.constant 0 : index
    %c0_8 = arith.constant 0 : index
    %4 = vector.load %arg4[%c0_7, %c0_8] : memref<64x128xf32, #tpu.memory_space<vmem>>, vector<64x128xf32>
    %c0_9 = arith.constant 0 : index
    %c0_10 = arith.constant 0 : index
    %5 = vector.load %arg5[%c0_9, %c0_10] : memref<1x128xf32, #tpu.memory_space<vmem>>, vector<1x128xf32>
    %cst = arith.constant dense<0.000000e+00> : vector<2x128xf32>
    %6 = tpu.matmul %0, %1, %cst {dimension_numbers = #tpu.dot_dimension_numbers<[1], [0], [0], [1], [0, 0, 1, 1], [], []>} : vector<2x4xf32>, vector<4x128xf32>, vector<2x128xf32> -> vector<2x128xf32>
    %7 = vector.broadcast %3 : vector<1x128xf32> to vector<2x128xf32>
    %8 = arith.addf %6, %7 : vector<2x128xf32>
    %cst_11 = arith.constant 0.000000e+00 : f32
    %9 = vector.broadcast %cst_11 : f32 to vector<2x32xf32>
    %cst_12 = arith.constant 0.000000e+00 : f32
    %10 = vector.broadcast %cst_12 : f32 to vector<2x32xf32>
    %cst_13 = arith.constant 0.000000e+00 : f32
    %11 = vector.broadcast %cst_13 : f32 to vector<2x32xf32>
    %cst_14 = arith.constant 0.000000e+00 : f32
    %12 = vector.broadcast %cst_14 : f32 to vector<2x32xf32>
    %cst_15 = arith.constant dense<0.000000e+00> : vector<2x128xf32>
    %13 = tpu.matmul %9, %2, %cst_15 {dimension_numbers = #tpu.dot_dimension_numbers<[1], [0], [0], [1], [0, 0, 1, 1], [], []>} : vector<2x32xf32>, vector<32x128xf32>, vector<2x128xf32> -> vector<2x128xf32>
    %14 = arith.addf %8, %13 : vector<2x128xf32>
    %15 = arith.negf %14 : vector<2x128xf32>
    %16 = math.exp %15 : vector<2x128xf32>
    %cst_16 = arith.constant 1.000000e+00 : f32
    %17 = vector.broadcast %cst_16 : f32 to vector<2x128xf32>
    %18 = arith.addf %17, %16 : vector<2x128xf32>
    %19 = arith.divf %17, %18 : vector<2x128xf32>
    %20 = math.tanh %14 : vector<2x128xf32>
    %21 = vector.extract_strided_slice %19 {offsets = [0, 0], sizes = [2, 32], strides = [1, 1]} : vector<2x128xf32> to vector<2x32xf32>
    %22 = vector.extract_strided_slice %19 {offsets = [0, 32], sizes = [2, 32], strides = [1, 1]} : vector<2x128xf32> to vector<2x32xf32>
    %23 = vector.extract_strided_slice %20 {offsets = [0, 64], sizes = [2, 32], strides = [1, 1]} : vector<2x128xf32> to vector<2x32xf32>
    %24 = vector.extract_strided_slice %19 {offsets = [0, 96], sizes = [2, 32], strides = [1, 1]} : vector<2x128xf32> to vector<2x32xf32>
    %25 = arith.mulf %22, %11 : vector<2x32xf32>
    %26 = arith.mulf %21, %23 : vector<2x32xf32>
    %27 = arith.addf %25, %26 : vector<2x32xf32>
    %28 = math.tanh %27 : vector<2x32xf32>
    %29 = arith.mulf %24, %28 : vector<2x32xf32>
    %30 = tpu.concatenate %29, %10 in 1 : vector<2x32xf32>, vector<2x32xf32> -> vector<2x64xf32>
    %cst_17 = arith.constant dense<0.000000e+00> : vector<2x128xf32>
    %31 = tpu.matmul %30, %4, %cst_17 {dimension_numbers = #tpu.dot_dimension_numbers<[1], [0], [0], [1], [0, 0, 1, 1], [], []>} : vector<2x64xf32>, vector<64x128xf32>, vector<2x128xf32> -> vector<2x128xf32>
    %32 = vector.broadcast %5 : vector<1x128xf32> to vector<2x128xf32>
    %33 = arith.addf %31, %32 : vector<2x128xf32>
    %34 = arith.negf %33 : vector<2x128xf32>
    %35 = math.exp %34 : vector<2x128xf32>
    %cst_18 = arith.constant 1.000000e+00 : f32
    %36 = vector.broadcast %cst_18 : f32 to vector<2x128xf32>
    %37 = arith.addf %36, %35 : vector<2x128xf32>
    %38 = arith.divf %36, %37 : vector<2x128xf32>
    %39 = math.tanh %33 : vector<2x128xf32>
    %40 = vector.extract_strided_slice %38 {offsets = [0, 0], sizes = [2, 32], strides = [1, 1]} : vector<2x128xf32> to vector<2x32xf32>
    %41 = vector.extract_strided_slice %38 {offsets = [0, 32], sizes = [2, 32], strides = [1, 1]} : vector<2x128xf32> to vector<2x32xf32>
    %42 = vector.extract_strided_slice %39 {offsets = [0, 64], sizes = [2, 32], strides = [1, 1]} : vector<2x128xf32> to vector<2x32xf32>
    %43 = vector.extract_strided_slice %38 {offsets = [0, 96], sizes = [2, 32], strides = [1, 1]} : vector<2x128xf32> to vector<2x32xf32>
    %44 = arith.mulf %41, %12 : vector<2x32xf32>
    %45 = arith.mulf %40, %42 : vector<2x32xf32>
    %46 = arith.addf %44, %45 : vector<2x32xf32>
    %47 = math.tanh %46 : vector<2x32xf32>
    %48 = arith.mulf %43, %47 : vector<2x32xf32>
    %cst_19 = arith.constant dense<0.000000e+00> : vector<2x128xf32>
    %49 = tpu.matmul %29, %2, %cst_19 {dimension_numbers = #tpu.dot_dimension_numbers<[1], [0], [0], [1], [0, 0, 1, 1], [], []>} : vector<2x32xf32>, vector<32x128xf32>, vector<2x128xf32> -> vector<2x128xf32>
    %50 = arith.addf %8, %49 : vector<2x128xf32>
    %51 = arith.negf %50 : vector<2x128xf32>
    %52 = math.exp %51 : vector<2x128xf32>
    %cst_20 = arith.constant 1.000000e+00 : f32
    %53 = vector.broadcast %cst_20 : f32 to vector<2x128xf32>
    %54 = arith.addf %53, %52 : vector<2x128xf32>
    %55 = arith.divf %53, %54 : vector<2x128xf32>
    %56 = math.tanh %50 : vector<2x128xf32>
    %57 = vector.extract_strided_slice %55 {offsets = [0, 0], sizes = [2, 32], strides = [1, 1]} : vector<2x128xf32> to vector<2x32xf32>
    %58 = vector.extract_strided_slice %55 {offsets = [0, 32], sizes = [2, 32], strides = [1, 1]} : vector<2x128xf32> to vector<2x32xf32>
    %59 = vector.extract_strided_slice %56 {offsets = [0, 64], sizes = [2, 32], strides = [1, 1]} : vector<2x128xf32> to vector<2x32xf32>
    %60 = vector.extract_strided_slice %55 {offsets = [0, 96], sizes = [2, 32], strides = [1, 1]} : vector<2x128xf32> to vector<2x32xf32>
    %61 = arith.mulf %58, %27 : vector<2x32xf32>
    %62 = arith.mulf %57, %59 : vector<2x32xf32>
    %63 = arith.addf %61, %62 : vector<2x32xf32>
    %64 = math.tanh %63 : vector<2x32xf32>
    %65 = arith.mulf %60, %64 : vector<2x32xf32>
    %66 = tpu.concatenate %65, %48 in 1 : vector<2x32xf32>, vector<2x32xf32> -> vector<2x64xf32>
    %cst_21 = arith.constant dense<0.000000e+00> : vector<2x128xf32>
    %67 = tpu.matmul %66, %4, %cst_21 {dimension_numbers = #tpu.dot_dimension_numbers<[1], [0], [0], [1], [0, 0, 1, 1], [], []>} : vector<2x64xf32>, vector<64x128xf32>, vector<2x128xf32> -> vector<2x128xf32>
    %68 = vector.broadcast %5 : vector<1x128xf32> to vector<2x128xf32>
    %69 = arith.addf %67, %68 : vector<2x128xf32>
    %70 = arith.negf %69 : vector<2x128xf32>
    %71 = math.exp %70 : vector<2x128xf32>
    %cst_22 = arith.constant 1.000000e+00 : f32
    %72 = vector.broadcast %cst_22 : f32 to vector<2x128xf32>
    %73 = arith.addf %72, %71 : vector<2x128xf32>
    %74 = arith.divf %72, %73 : vector<2x128xf32>
    %75 = math.tanh %69 : vector<2x128xf32>
    %76 = vector.extract_strided_slice %74 {offsets = [0, 0], sizes = [2, 32], strides = [1, 1]} : vector<2x128xf32> to vector<2x32xf32>
    %77 = vector.extract_strided_slice %74 {offsets = [0, 32], sizes = [2, 32], strides = [1, 1]} : vector<2x128xf32> to vector<2x32xf32>
    %78 = vector.extract_strided_slice %75 {offsets = [0, 64], sizes = [2, 32], strides = [1, 1]} : vector<2x128xf32> to vector<2x32xf32>
    %79 = vector.extract_strided_slice %74 {offsets = [0, 96], sizes = [2, 32], strides = [1, 1]} : vector<2x128xf32> to vector<2x32xf32>
    %80 = arith.mulf %77, %46 : vector<2x32xf32>
    %81 = arith.mulf %76, %78 : vector<2x32xf32>
    %82 = arith.addf %80, %81 : vector<2x32xf32>
    %83 = math.tanh %82 : vector<2x32xf32>
    %84 = arith.mulf %79, %83 : vector<2x32xf32>
    %cst_23 = arith.constant dense<0.000000e+00> : vector<2x128xf32>
    %85 = tpu.matmul %65, %2, %cst_23 {dimension_numbers = #tpu.dot_dimension_numbers<[1], [0], [0], [1], [0, 0, 1, 1], [], []>} : vector<2x32xf32>, vector<32x128xf32>, vector<2x128xf32> -> vector<2x128xf32>
    %86 = arith.addf %8, %85 : vector<2x128xf32>
    %87 = arith.negf %86 : vector<2x128xf32>
    %88 = math.exp %87 : vector<2x128xf32>
    %cst_24 = arith.constant 1.000000e+00 : f32
    %89 = vector.broadcast %cst_24 : f32 to vector<2x128xf32>
    %90 = arith.addf %89, %88 : vector<2x128xf32>
    %91 = arith.divf %89, %90 : vector<2x128xf32>
    %92 = math.tanh %86 : vector<2x128xf32>
    %93 = vector.extract_strided_slice %91 {offsets = [0, 0], sizes = [2, 32], strides = [1, 1]} : vector<2x128xf32> to vector<2x32xf32>
    %94 = vector.extract_strided_slice %91 {offsets = [0, 32], sizes = [2, 32], strides = [1, 1]} : vector<2x128xf32> to vector<2x32xf32>
    %95 = vector.extract_strided_slice %92 {offsets = [0, 64], sizes = [2, 32], strides = [1, 1]} : vector<2x128xf32> to vector<2x32xf32>
    %96 = vector.extract_strided_slice %91 {offsets = [0, 96], sizes = [2, 32], strides = [1, 1]} : vector<2x128xf32> to vector<2x32xf32>
    %97 = arith.mulf %94, %63 : vector<2x32xf32>
    %98 = arith.mulf %93, %95 : vector<2x32xf32>
    %99 = arith.addf %97, %98 : vector<2x32xf32>
    %100 = math.tanh %99 : vector<2x32xf32>
    %101 = arith.mulf %96, %100 : vector<2x32xf32>
    %102 = tpu.concatenate %101, %84 in 1 : vector<2x32xf32>, vector<2x32xf32> -> vector<2x64xf32>
    %cst_25 = arith.constant dense<0.000000e+00> : vector<2x128xf32>
    %103 = tpu.matmul %102, %4, %cst_25 {dimension_numbers = #tpu.dot_dimension_numbers<[1], [0], [0], [1], [0, 0, 1, 1], [], []>} : vector<2x64xf32>, vector<64x128xf32>, vector<2x128xf32> -> vector<2x128xf32>
    %104 = vector.broadcast %5 : vector<1x128xf32> to vector<2x128xf32>
    %105 = arith.addf %103, %104 : vector<2x128xf32>
    %106 = arith.negf %105 : vector<2x128xf32>
    %107 = math.exp %106 : vector<2x128xf32>
    %cst_26 = arith.constant 1.000000e+00 : f32
    %108 = vector.broadcast %cst_26 : f32 to vector<2x128xf32>
    %109 = arith.addf %108, %107 : vector<2x128xf32>
    %110 = arith.divf %108, %109 : vector<2x128xf32>
    %111 = math.tanh %105 : vector<2x128xf32>
    %112 = vector.extract_strided_slice %110 {offsets = [0, 0], sizes = [2, 32], strides = [1, 1]} : vector<2x128xf32> to vector<2x32xf32>
    %113 = vector.extract_strided_slice %110 {offsets = [0, 32], sizes = [2, 32], strides = [1, 1]} : vector<2x128xf32> to vector<2x32xf32>
    %114 = vector.extract_strided_slice %111 {offsets = [0, 64], sizes = [2, 32], strides = [1, 1]} : vector<2x128xf32> to vector<2x32xf32>
    %115 = vector.extract_strided_slice %110 {offsets = [0, 96], sizes = [2, 32], strides = [1, 1]} : vector<2x128xf32> to vector<2x32xf32>
    %116 = arith.mulf %113, %82 : vector<2x32xf32>
    %117 = arith.mulf %112, %114 : vector<2x32xf32>
    %118 = arith.addf %116, %117 : vector<2x32xf32>
    %119 = math.tanh %118 : vector<2x32xf32>
    %120 = arith.mulf %115, %119 : vector<2x32xf32>
    %cst_27 = arith.constant dense<0.000000e+00> : vector<2x128xf32>
    %121 = tpu.matmul %101, %2, %cst_27 {dimension_numbers = #tpu.dot_dimension_numbers<[1], [0], [0], [1], [0, 0, 1, 1], [], []>} : vector<2x32xf32>, vector<32x128xf32>, vector<2x128xf32> -> vector<2x128xf32>
    %122 = arith.addf %8, %121 : vector<2x128xf32>
    %123 = arith.negf %122 : vector<2x128xf32>
    %124 = math.exp %123 : vector<2x128xf32>
    %cst_28 = arith.constant 1.000000e+00 : f32
    %125 = vector.broadcast %cst_28 : f32 to vector<2x128xf32>
    %126 = arith.addf %125, %124 : vector<2x128xf32>
    %127 = arith.divf %125, %126 : vector<2x128xf32>
    %128 = math.tanh %122 : vector<2x128xf32>
    %129 = vector.extract_strided_slice %127 {offsets = [0, 0], sizes = [2, 32], strides = [1, 1]} : vector<2x128xf32> to vector<2x32xf32>
    %130 = vector.extract_strided_slice %127 {offsets = [0, 32], sizes = [2, 32], strides = [1, 1]} : vector<2x128xf32> to vector<2x32xf32>
    %131 = vector.extract_strided_slice %128 {offsets = [0, 64], sizes = [2, 32], strides = [1, 1]} : vector<2x128xf32> to vector<2x32xf32>
    %132 = vector.extract_strided_slice %127 {offsets = [0, 96], sizes = [2, 32], strides = [1, 1]} : vector<2x128xf32> to vector<2x32xf32>
    %133 = arith.mulf %130, %99 : vector<2x32xf32>
    %134 = arith.mulf %129, %131 : vector<2x32xf32>
    %135 = arith.addf %133, %134 : vector<2x32xf32>
    %136 = math.tanh %135 : vector<2x32xf32>
    %137 = arith.mulf %132, %136 : vector<2x32xf32>
    %138 = tpu.concatenate %137, %120 in 1 : vector<2x32xf32>, vector<2x32xf32> -> vector<2x64xf32>
    %cst_29 = arith.constant dense<0.000000e+00> : vector<2x128xf32>
    %139 = tpu.matmul %138, %4, %cst_29 {dimension_numbers = #tpu.dot_dimension_numbers<[1], [0], [0], [1], [0, 0, 1, 1], [], []>} : vector<2x64xf32>, vector<64x128xf32>, vector<2x128xf32> -> vector<2x128xf32>
    %140 = vector.broadcast %5 : vector<1x128xf32> to vector<2x128xf32>
    %141 = arith.addf %139, %140 : vector<2x128xf32>
    %142 = arith.negf %141 : vector<2x128xf32>
    %143 = math.exp %142 : vector<2x128xf32>
    %cst_30 = arith.constant 1.000000e+00 : f32
    %144 = vector.broadcast %cst_30 : f32 to vector<2x128xf32>
    %145 = arith.addf %144, %143 : vector<2x128xf32>
    %146 = arith.divf %144, %145 : vector<2x128xf32>
    %147 = math.tanh %141 : vector<2x128xf32>
    %148 = vector.extract_strided_slice %146 {offsets = [0, 0], sizes = [2, 32], strides = [1, 1]} : vector<2x128xf32> to vector<2x32xf32>
    %149 = vector.extract_strided_slice %146 {offsets = [0, 32], sizes = [2, 32], strides = [1, 1]} : vector<2x128xf32> to vector<2x32xf32>
    %150 = vector.extract_strided_slice %147 {offsets = [0, 64], sizes = [2, 32], strides = [1, 1]} : vector<2x128xf32> to vector<2x32xf32>
    %151 = vector.extract_strided_slice %146 {offsets = [0, 96], sizes = [2, 32], strides = [1, 1]} : vector<2x128xf32> to vector<2x32xf32>
    %152 = arith.mulf %149, %118 : vector<2x32xf32>
    %153 = arith.mulf %148, %150 : vector<2x32xf32>
    %154 = arith.addf %152, %153 : vector<2x32xf32>
    %155 = math.tanh %154 : vector<2x32xf32>
    %156 = arith.mulf %151, %155 : vector<2x32xf32>
    %cst_31 = arith.constant dense<0.000000e+00> : vector<2x128xf32>
    %157 = tpu.matmul %137, %2, %cst_31 {dimension_numbers = #tpu.dot_dimension_numbers<[1], [0], [0], [1], [0, 0, 1, 1], [], []>} : vector<2x32xf32>, vector<32x128xf32>, vector<2x128xf32> -> vector<2x128xf32>
    %158 = arith.addf %8, %157 : vector<2x128xf32>
    %159 = arith.negf %158 : vector<2x128xf32>
    %160 = math.exp %159 : vector<2x128xf32>
    %cst_32 = arith.constant 1.000000e+00 : f32
    %161 = vector.broadcast %cst_32 : f32 to vector<2x128xf32>
    %162 = arith.addf %161, %160 : vector<2x128xf32>
    %163 = arith.divf %161, %162 : vector<2x128xf32>
    %164 = math.tanh %158 : vector<2x128xf32>
    %165 = vector.extract_strided_slice %163 {offsets = [0, 0], sizes = [2, 32], strides = [1, 1]} : vector<2x128xf32> to vector<2x32xf32>
    %166 = vector.extract_strided_slice %163 {offsets = [0, 32], sizes = [2, 32], strides = [1, 1]} : vector<2x128xf32> to vector<2x32xf32>
    %167 = vector.extract_strided_slice %164 {offsets = [0, 64], sizes = [2, 32], strides = [1, 1]} : vector<2x128xf32> to vector<2x32xf32>
    %168 = vector.extract_strided_slice %163 {offsets = [0, 96], sizes = [2, 32], strides = [1, 1]} : vector<2x128xf32> to vector<2x32xf32>
    %169 = arith.mulf %166, %135 : vector<2x32xf32>
    %170 = arith.mulf %165, %167 : vector<2x32xf32>
    %171 = arith.addf %169, %170 : vector<2x32xf32>
    %172 = math.tanh %171 : vector<2x32xf32>
    %173 = arith.mulf %168, %172 : vector<2x32xf32>
    %174 = tpu.concatenate %173, %156 in 1 : vector<2x32xf32>, vector<2x32xf32> -> vector<2x64xf32>
    %cst_33 = arith.constant dense<0.000000e+00> : vector<2x128xf32>
    %175 = tpu.matmul %174, %4, %cst_33 {dimension_numbers = #tpu.dot_dimension_numbers<[1], [0], [0], [1], [0, 0, 1, 1], [], []>} : vector<2x64xf32>, vector<64x128xf32>, vector<2x128xf32> -> vector<2x128xf32>
    %176 = vector.broadcast %5 : vector<1x128xf32> to vector<2x128xf32>
    %177 = arith.addf %175, %176 : vector<2x128xf32>
    %178 = arith.negf %177 : vector<2x128xf32>
    %179 = math.exp %178 : vector<2x128xf32>
    %cst_34 = arith.constant 1.000000e+00 : f32
    %180 = vector.broadcast %cst_34 : f32 to vector<2x128xf32>
    %181 = arith.addf %180, %179 : vector<2x128xf32>
    %182 = arith.divf %180, %181 : vector<2x128xf32>
    %183 = math.tanh %177 : vector<2x128xf32>
    %184 = vector.extract_strided_slice %182 {offsets = [0, 0], sizes = [2, 32], strides = [1, 1]} : vector<2x128xf32> to vector<2x32xf32>
    %185 = vector.extract_strided_slice %182 {offsets = [0, 32], sizes = [2, 32], strides = [1, 1]} : vector<2x128xf32> to vector<2x32xf32>
    %186 = vector.extract_strided_slice %183 {offsets = [0, 64], sizes = [2, 32], strides = [1, 1]} : vector<2x128xf32> to vector<2x32xf32>
    %187 = vector.extract_strided_slice %182 {offsets = [0, 96], sizes = [2, 32], strides = [1, 1]} : vector<2x128xf32> to vector<2x32xf32>
    %188 = arith.mulf %185, %154 : vector<2x32xf32>
    %189 = arith.mulf %184, %186 : vector<2x32xf32>
    %190 = arith.addf %188, %189 : vector<2x32xf32>
    %191 = math.tanh %190 : vector<2x32xf32>
    %192 = arith.mulf %187, %191 : vector<2x32xf32>
    %cst_35 = arith.constant dense<0.000000e+00> : vector<2x128xf32>
    %193 = tpu.matmul %173, %2, %cst_35 {dimension_numbers = #tpu.dot_dimension_numbers<[1], [0], [0], [1], [0, 0, 1, 1], [], []>} : vector<2x32xf32>, vector<32x128xf32>, vector<2x128xf32> -> vector<2x128xf32>
    %194 = arith.addf %8, %193 : vector<2x128xf32>
    %195 = arith.negf %194 : vector<2x128xf32>
    %196 = math.exp %195 : vector<2x128xf32>
    %cst_36 = arith.constant 1.000000e+00 : f32
    %197 = vector.broadcast %cst_36 : f32 to vector<2x128xf32>
    %198 = arith.addf %197, %196 : vector<2x128xf32>
    %199 = arith.divf %197, %198 : vector<2x128xf32>
    %200 = math.tanh %194 : vector<2x128xf32>
    %201 = vector.extract_strided_slice %199 {offsets = [0, 0], sizes = [2, 32], strides = [1, 1]} : vector<2x128xf32> to vector<2x32xf32>
    %202 = vector.extract_strided_slice %199 {offsets = [0, 32], sizes = [2, 32], strides = [1, 1]} : vector<2x128xf32> to vector<2x32xf32>
    %203 = vector.extract_strided_slice %200 {offsets = [0, 64], sizes = [2, 32], strides = [1, 1]} : vector<2x128xf32> to vector<2x32xf32>
    %204 = vector.extract_strided_slice %199 {offsets = [0, 96], sizes = [2, 32], strides = [1, 1]} : vector<2x128xf32> to vector<2x32xf32>
    %205 = arith.mulf %202, %171 : vector<2x32xf32>
    %206 = arith.mulf %201, %203 : vector<2x32xf32>
    %207 = arith.addf %205, %206 : vector<2x32xf32>
    %208 = math.tanh %207 : vector<2x32xf32>
    %209 = arith.mulf %204, %208 : vector<2x32xf32>
    %210 = tpu.concatenate %209, %192 in 1 : vector<2x32xf32>, vector<2x32xf32> -> vector<2x64xf32>
    %cst_37 = arith.constant dense<0.000000e+00> : vector<2x128xf32>
    %211 = tpu.matmul %210, %4, %cst_37 {dimension_numbers = #tpu.dot_dimension_numbers<[1], [0], [0], [1], [0, 0, 1, 1], [], []>} : vector<2x64xf32>, vector<64x128xf32>, vector<2x128xf32> -> vector<2x128xf32>
    %212 = vector.broadcast %5 : vector<1x128xf32> to vector<2x128xf32>
    %213 = arith.addf %211, %212 : vector<2x128xf32>
    %214 = arith.negf %213 : vector<2x128xf32>
    %215 = math.exp %214 : vector<2x128xf32>
    %cst_38 = arith.constant 1.000000e+00 : f32
    %216 = vector.broadcast %cst_38 : f32 to vector<2x128xf32>
    %217 = arith.addf %216, %215 : vector<2x128xf32>
    %218 = arith.divf %216, %217 : vector<2x128xf32>
    %219 = math.tanh %213 : vector<2x128xf32>
    %220 = vector.extract_strided_slice %218 {offsets = [0, 0], sizes = [2, 32], strides = [1, 1]} : vector<2x128xf32> to vector<2x32xf32>
    %221 = vector.extract_strided_slice %218 {offsets = [0, 32], sizes = [2, 32], strides = [1, 1]} : vector<2x128xf32> to vector<2x32xf32>
    %222 = vector.extract_strided_slice %219 {offsets = [0, 64], sizes = [2, 32], strides = [1, 1]} : vector<2x128xf32> to vector<2x32xf32>
    %223 = vector.extract_strided_slice %218 {offsets = [0, 96], sizes = [2, 32], strides = [1, 1]} : vector<2x128xf32> to vector<2x32xf32>
    %224 = arith.mulf %221, %190 : vector<2x32xf32>
    %225 = arith.mulf %220, %222 : vector<2x32xf32>
    %226 = arith.addf %224, %225 : vector<2x32xf32>
    %227 = math.tanh %226 : vector<2x32xf32>
    %228 = arith.mulf %223, %227 : vector<2x32xf32>
    %cst_39 = arith.constant dense<0.000000e+00> : vector<2x128xf32>
    %229 = tpu.matmul %209, %2, %cst_39 {dimension_numbers = #tpu.dot_dimension_numbers<[1], [0], [0], [1], [0, 0, 1, 1], [], []>} : vector<2x32xf32>, vector<32x128xf32>, vector<2x128xf32> -> vector<2x128xf32>
    %230 = arith.addf %8, %229 : vector<2x128xf32>
    %231 = arith.negf %230 : vector<2x128xf32>
    %232 = math.exp %231 : vector<2x128xf32>
    %cst_40 = arith.constant 1.000000e+00 : f32
    %233 = vector.broadcast %cst_40 : f32 to vector<2x128xf32>
    %234 = arith.addf %233, %232 : vector<2x128xf32>
    %235 = arith.divf %233, %234 : vector<2x128xf32>
    %236 = math.tanh %230 : vector<2x128xf32>
    %237 = vector.extract_strided_slice %235 {offsets = [0, 0], sizes = [2, 32], strides = [1, 1]} : vector<2x128xf32> to vector<2x32xf32>
    %238 = vector.extract_strided_slice %235 {offsets = [0, 32], sizes = [2, 32], strides = [1, 1]} : vector<2x128xf32> to vector<2x32xf32>
    %239 = vector.extract_strided_slice %236 {offsets = [0, 64], sizes = [2, 32], strides = [1, 1]} : vector<2x128xf32> to vector<2x32xf32>
    %240 = vector.extract_strided_slice %235 {offsets = [0, 96], sizes = [2, 32], strides = [1, 1]} : vector<2x128xf32> to vector<2x32xf32>
    %241 = arith.mulf %238, %207 : vector<2x32xf32>
    %242 = arith.mulf %237, %239 : vector<2x32xf32>
    %243 = arith.addf %241, %242 : vector<2x32xf32>
    %244 = math.tanh %243 : vector<2x32xf32>
    %245 = arith.mulf %240, %244 : vector<2x32xf32>
    %246 = tpu.concatenate %245, %228 in 1 : vector<2x32xf32>, vector<2x32xf32> -> vector<2x64xf32>
    %cst_41 = arith.constant dense<0.000000e+00> : vector<2x128xf32>
    %247 = tpu.matmul %246, %4, %cst_41 {dimension_numbers = #tpu.dot_dimension_numbers<[1], [0], [0], [1], [0, 0, 1, 1], [], []>} : vector<2x64xf32>, vector<64x128xf32>, vector<2x128xf32> -> vector<2x128xf32>
    %248 = vector.broadcast %5 : vector<1x128xf32> to vector<2x128xf32>
    %249 = arith.addf %247, %248 : vector<2x128xf32>
    %250 = arith.negf %249 : vector<2x128xf32>
    %251 = math.exp %250 : vector<2x128xf32>
    %cst_42 = arith.constant 1.000000e+00 : f32
    %252 = vector.broadcast %cst_42 : f32 to vector<2x128xf32>
    %253 = arith.addf %252, %251 : vector<2x128xf32>
    %254 = arith.divf %252, %253 : vector<2x128xf32>
    %255 = math.tanh %249 : vector<2x128xf32>
    %256 = vector.extract_strided_slice %254 {offsets = [0, 0], sizes = [2, 32], strides = [1, 1]} : vector<2x128xf32> to vector<2x32xf32>
    %257 = vector.extract_strided_slice %254 {offsets = [0, 32], sizes = [2, 32], strides = [1, 1]} : vector<2x128xf32> to vector<2x32xf32>
    %258 = vector.extract_strided_slice %255 {offsets = [0, 64], sizes = [2, 32], strides = [1, 1]} : vector<2x128xf32> to vector<2x32xf32>
    %259 = vector.extract_strided_slice %254 {offsets = [0, 96], sizes = [2, 32], strides = [1, 1]} : vector<2x128xf32> to vector<2x32xf32>
    %260 = arith.mulf %257, %226 : vector<2x32xf32>
    %261 = arith.mulf %256, %258 : vector<2x32xf32>
    %262 = arith.addf %260, %261 : vector<2x32xf32>
    %263 = math.tanh %262 : vector<2x32xf32>
    %264 = arith.mulf %259, %263 : vector<2x32xf32>
    %cst_43 = arith.constant dense<0.000000e+00> : vector<2x128xf32>
    %265 = tpu.matmul %245, %2, %cst_43 {dimension_numbers = #tpu.dot_dimension_numbers<[1], [0], [0], [1], [0, 0, 1, 1], [], []>} : vector<2x32xf32>, vector<32x128xf32>, vector<2x128xf32> -> vector<2x128xf32>
    %266 = arith.addf %8, %265 : vector<2x128xf32>
    %267 = arith.negf %266 : vector<2x128xf32>
    %268 = math.exp %267 : vector<2x128xf32>
    %cst_44 = arith.constant 1.000000e+00 : f32
    %269 = vector.broadcast %cst_44 : f32 to vector<2x128xf32>
    %270 = arith.addf %269, %268 : vector<2x128xf32>
    %271 = arith.divf %269, %270 : vector<2x128xf32>
    %272 = math.tanh %266 : vector<2x128xf32>
    %273 = vector.extract_strided_slice %271 {offsets = [0, 0], sizes = [2, 32], strides = [1, 1]} : vector<2x128xf32> to vector<2x32xf32>
    %274 = vector.extract_strided_slice %271 {offsets = [0, 32], sizes = [2, 32], strides = [1, 1]} : vector<2x128xf32> to vector<2x32xf32>
    %275 = vector.extract_strided_slice %272 {offsets = [0, 64], sizes = [2, 32], strides = [1, 1]} : vector<2x128xf32> to vector<2x32xf32>
    %276 = vector.extract_strided_slice %271 {offsets = [0, 96], sizes = [2, 32], strides = [1, 1]} : vector<2x128xf32> to vector<2x32xf32>
    %277 = arith.mulf %274, %243 : vector<2x32xf32>
    %278 = arith.mulf %273, %275 : vector<2x32xf32>
    %279 = arith.addf %277, %278 : vector<2x32xf32>
    %280 = math.tanh %279 : vector<2x32xf32>
    %281 = arith.mulf %276, %280 : vector<2x32xf32>
    %282 = tpu.concatenate %281, %264 in 1 : vector<2x32xf32>, vector<2x32xf32> -> vector<2x64xf32>
    %cst_45 = arith.constant dense<0.000000e+00> : vector<2x128xf32>
    %283 = tpu.matmul %282, %4, %cst_45 {dimension_numbers = #tpu.dot_dimension_numbers<[1], [0], [0], [1], [0, 0, 1, 1], [], []>} : vector<2x64xf32>, vector<64x128xf32>, vector<2x128xf32> -> vector<2x128xf32>
    %284 = vector.broadcast %5 : vector<1x128xf32> to vector<2x128xf32>
    %285 = arith.addf %283, %284 : vector<2x128xf32>
    %286 = arith.negf %285 : vector<2x128xf32>
    %287 = math.exp %286 : vector<2x128xf32>
    %cst_46 = arith.constant 1.000000e+00 : f32
    %288 = vector.broadcast %cst_46 : f32 to vector<2x128xf32>
    %289 = arith.addf %288, %287 : vector<2x128xf32>
    %290 = arith.divf %288, %289 : vector<2x128xf32>
    %291 = math.tanh %285 : vector<2x128xf32>
    %292 = vector.extract_strided_slice %290 {offsets = [0, 0], sizes = [2, 32], strides = [1, 1]} : vector<2x128xf32> to vector<2x32xf32>
    %293 = vector.extract_strided_slice %290 {offsets = [0, 32], sizes = [2, 32], strides = [1, 1]} : vector<2x128xf32> to vector<2x32xf32>
    %294 = vector.extract_strided_slice %291 {offsets = [0, 64], sizes = [2, 32], strides = [1, 1]} : vector<2x128xf32> to vector<2x32xf32>
    %295 = vector.extract_strided_slice %290 {offsets = [0, 96], sizes = [2, 32], strides = [1, 1]} : vector<2x128xf32> to vector<2x32xf32>
    %296 = arith.mulf %293, %262 : vector<2x32xf32>
    %297 = arith.mulf %292, %294 : vector<2x32xf32>
    %298 = arith.addf %296, %297 : vector<2x32xf32>
    %299 = math.tanh %298 : vector<2x32xf32>
    %300 = arith.mulf %295, %299 : vector<2x32xf32>
    %301 = tpu.concatenate %48, %84, %120, %156, %192, %228, %264, %300 in 1 : vector<2x32xf32>, vector<2x32xf32>, vector<2x32xf32>, vector<2x32xf32>, vector<2x32xf32>, vector<2x32xf32>, vector<2x32xf32>, vector<2x32xf32> -> vector<2x256xf32>
    %c0_47 = arith.constant 0 : index
    %c0_48 = arith.constant 0 : index
    %302 = vector.load %arg6[%c0_47, %c0_48] : memref<2x256xf32, #tpu.memory_space<vmem>>, vector<2x256xf32>
    tpu.vector_store %arg6[%c0_47, %c0_48], %301 {strides = array<i32>} : memref<2x256xf32, #tpu.memory_space<vmem>>, vector<2x256xf32>,
    return
  }
}

</mosaic_0001>

<bundles_post_ra>
// kernel: tpu_custom_call.1
= control target key start
LH: loop header
LB: loop body
LE: loop exit
PB: predicated region body
PF: predicated region fallthrough
CT: control target
= control target key end

     0   :  { %11 = vsyncpa [#allocation3], 0  ;;  %s1889_s0 = inlined_call_operand.hbm [shape: f32[2,4], index: 0, kind: input, shape index: {}]   ;;  %s1890_s1 = inlined_call_operand.hbm [shape: f32[4,128], index: 1, kind: input, shape index: {}]   ;;  %s1891_s2 = inlined_call_operand.hbm [shape: f32[32,128], index: 2, kind: input, shape index: {}]   ;;  %s1892_s3 = inlined_call_operand.vmem [shape: f32[1,128], index: 3, kind: input, shape index: {}]   ;;  %s1893_s4 = inlined_call_operand.hbm [shape: f32[64,128], index: 4, kind: input, shape index: {}]   ;;  %s1894_s5 = inlined_call_operand.vmem [shape: f32[1,128], index: 5, kind: input, shape index: {}]   ;;  %s1895_s6 = inlined_call_operand.hbm [shape: f32[2,256], index: 6, kind: output, shape index: {}]  }
   0x1   :  { %12 = vsyncpa [#allocation6], 0 }
   0x2   :  { %13 = vsyncpa [#allocation9], 0  ;;  %s31_s23 = sshll.u32 %s1890_s1, 4  ;;  %s32_s23 = int_to_ptr.hbm [resolvable:$true] %s31_s23 }
   0x3   :  { %14 = vsyncpa [#allocation4], 0  ;;  %s1512_s24 = smov [#allocation5]   ;;  %s20_s28 = sshll.u32 %s1889_s0, 4  ;;  %s21_s28 = int_to_ptr.hbm [resolvable:$true] %s20_s28 }
   0x4   :  { %s33_s25 = sshll.u32 %s1512_s24, 4  ;;  %s1513_s29 = smov [#allocation2]   ;;  %s34_s25 = int_to_ptr.vmem [resolvable:$true] %s33_s25 }
   0x5   :  { %36 = dma.hbm_to_vmem [thread:$0]  %s32_s23, 64, %s34_s25, [#allocation6]  }
   0x6   :  { %s22_s30 = sshll.u32 %s1513_s29, 4  ;;  %s41_s9 = sshll.u32 %s1891_s2, 4  ;;  %s23_s30 = int_to_ptr.vmem [resolvable:$true] %s22_s30  ;;  %s42_s9 = int_to_ptr.hbm [resolvable:$true] %s41_s9 }
   0x7   :  { %25 = dma.hbm_to_vmem [thread:$0]  %s21_s28, 32, %s23_s30, [#allocation3]  }
   0x8   :  { %s1514_s1 = smov [#allocation7]   ;;  %s56_s13 = sshll.u32 %s1893_s4, 4  ;;  %s57_s13 = int_to_ptr.hbm [resolvable:$true] %s56_s13 }
   0x9   :  { %s43_s10 = sshll.u32 %s1514_s1, 4  ;;  %s1515_s14 = smov 128   ;;  %s44_s10 = int_to_ptr.vmem [resolvable:$true] %s43_s10 }
   0xa   :  { %s1516_s0 = smov 8   ;;  %s1517_s15 = smov [#allocation8]  }
   0xb   :  { %49 = dma.hbm_to_vmem [thread:$0]  %s42_s9, 512, %s44_s10, [#allocation6], %s1515_s14, %s1515_s14, %s1516_s0  }
   0xc   :  { %s58_s16 = sshll.u32 %s1517_s15, 4  ;;  %s59_s16 = int_to_ptr.vmem [resolvable:$true] %s58_s16 }
   0xd   :  { %64 = dma.hbm_to_vmem [thread:$0]  %s57_s13, 1024, %s59_s16, [#allocation9], %s1515_s14, %s1515_s14, %s1516_s0  }
   0xe   :  { %1504 = dma.done.wait [#allocation3], 32  }
   0xf   :  { %1505 = vsyncadd [#allocation3], 4294967264 }
  0x10   :  { %1506 = dma.done.wait [#allocation6], 576  }
  0x11   :  { %1507 = vsyncadd [#allocation6], 4294966720 }
  0x12   :  { %1508 = dma.done.wait [#allocation9], 1024  }
  0x13   :  { %1509 = vsyncadd [#allocation9], 4294966272  ;;  %vm106_vm0 = vcmask 1043456   ;;  %vm102_vm1 = vcmask 31744   ;;  %v1570_v0 = vld [vmem:[#allocation7 + $0x18] sm:$0xff]  ;;  %v1572_v1 = vld [vmem:[#allocation7 + $0x10] sm:$0xff] }
  0x14   :  { %v84_v2 = vld [vmem:[#allocation5] sm:$0xf]  ;;  %146 = vmatpush.msra.mxu1 %v1570_v0  ;;  %v83_v3 = vld [vmem:[#allocation2] sm:$0x3]  ;;  %v1575_v4 = vld [vmem:[#allocation7 + $0x8] sm:$0xff]  ;;  %275 = vmatpush.msra.mxu3 %v1570_v0  ;;  %v1518_v6 = vmov 0.0  }
  0x15   :  { %1209 = vmatpush.msk.msra.mxu0 %vm106_vm0, %v84_v2  ;;  %v1579_v5 = vld [vmem:[#allocation7] sm:$0xff]  ;;  %v1253_v7 = vld [vmem:[%s1892_s3] ss:$0 sm:$0xff]  ;;  %s1519_s17 = smov 64   ;;  %s1520_s3 = smov 32   ;;  %v1608_v33 = vld [vmem:[#allocation8 + $0x30] sm:$0xff] }
  0x16   :  { %1210 = vmatmul.msk.f32.vlgmr.msra.gmra.mxu0 %vm102_vm1, %v83_v3  ;;  %147 = vmatpush.msra.mxu1 %v1572_v1  ;;  %v1606_v32 = vld [vmem:[#allocation8 + $0x38] sm:$0xff]  ;;  %v1612_v34 = vld [vmem:[#allocation8 + $0x28] sm:$0xff]  ;;  %v1617_v35 = vld [vmem:[#allocation8 + $0x20] sm:$0xff]  ;;  %vm130_vm6 = vcmask 261120   ;;  %vm200_vm7 = vcmask 523264   ;;  %s1521_s22 = smov 96  }
  0x17   :  { %276 = vmatpush.msra.mxu3 %v1572_v1  ;;  %212 = vmatpush.msra.mxu2 %v1606_v32  ;;  %v1622_v36 = vld [vmem:[#allocation8 + $0x18] sm:$0xff]  ;;  %v1627_v37 = vld [vmem:[#allocation8 + $0x10] sm:$0xff]  ;;  %v1632_v38 = vld [vmem:[#allocation8 + $0x8] sm:$0xff]  ;;  %s1197_s26 = sshll.u32 %s1895_s6, 4  ;;  %s1198_s26 = int_to_ptr.hbm [resolvable:$true] %s1197_s26 }
  0x18   :  { %148 = vmatpush.msra.mxu1 %v1575_v4  ;;  %341 = vmatpush.msrb.mxu0 %v1606_v32  ;;  %v1642_v41 = vld [vmem:[#allocation8] sm:$0xff]  ;;  %v1677_v44 = vld [vmem:[%s1894_s5] ss:$0 sm:$0xff] }
  0x19   :  { %277 = vmatpush.msra.mxu3 %v1575_v4  ;;  %213 = vmatpush.msra.mxu2 %v1608_v33 }
  0x1a   :  { %149 = vmatpush.msra.mxu1 %v1579_v5  ;;  %342 = vmatpush.msrb.mxu0 %v1608_v33 }
  0x1b   :  { %150 = vmatmul.f32.vlgmr.msra.gmra.mxu1 %v1518_v6  ;;  %278 = vmatpush.msra.mxu3 %v1579_v5 }
  0x1c   :  { %404 = vmatpush.msrb.mxu1 %v1570_v0  ;;  %214 = vmatpush.msra.mxu2 %v1612_v34 }
  0x1d   :  { %470 = vmatpush.msrb.mxu3 %v1606_v32  ;;  %343 = vmatpush.msrb.mxu0 %v1612_v34 }
  0x1e   :  { %405 = vmatpush.msrb.mxu1 %v1572_v1  ;;  %215 = vmatpush.msra.mxu2 %v1617_v35 }
  0x1f   :  { %471 = vmatpush.msrb.mxu3 %v1608_v33  ;;  %344 = vmatpush.msrb.mxu0 %v1617_v35 }
  0x20   :  { %406 = vmatpush.msrb.mxu1 %v1575_v4  ;;  %216 = vmatpush.msra.mxu2 %v1622_v36 }
  0x21   :  { %472 = vmatpush.msrb.mxu3 %v1612_v34  ;;  %345 = vmatpush.msrb.mxu0 %v1622_v36 }
  0x22   :  { %407 = vmatpush.msrb.mxu1 %v1579_v5  ;;  %217 = vmatpush.msra.mxu2 %v1627_v37 }
  0x23   :  { %473 = vmatpush.msrb.mxu3 %v1617_v35  ;;  %346 = vmatpush.msrb.mxu0 %v1627_v37 }
  0x24   :  { %533 = vmatpush.msra.mxu1 %v1570_v0  ;;  %218 = vmatpush.msra.mxu2 %v1632_v38 }
  0x25   :  { %474 = vmatpush.msrb.mxu3 %v1622_v36  ;;  %347 = vmatpush.msrb.mxu0 %v1632_v38 }
  0x26   :  { %534 = vmatpush.msra.mxu1 %v1572_v1  ;;  %219 = vmatpush.msra.mxu2 %v1642_v41 }
  0x27   :  { %475 = vmatpush.msrb.mxu3 %v1627_v37  ;;  %348 = vmatpush.msrb.mxu0 %v1642_v41 }
  0x28   :  { %535 = vmatpush.msra.mxu1 %v1575_v4  ;;  %599 = vmatpush.msrb.mxu2 %v1606_v32 }
  0x29   :  { %476 = vmatpush.msrb.mxu3 %v1632_v38  ;;  %662 = vmatpush.msra.mxu0 %v1570_v0 }
  0x2a   :  { %536 = vmatpush.msra.mxu1 %v1579_v5  ;;  %600 = vmatpush.msrb.mxu2 %v1608_v33 }
  0x2b   :  { %477 = vmatpush.msrb.mxu3 %v1642_v41  ;;  %663 = vmatpush.msra.mxu0 %v1572_v1 }
  0x2c   :  { %601 = vmatpush.msrb.mxu2 %v1612_v34 }
  0x2d   :  { %664 = vmatpush.msra.mxu0 %v1575_v4 }
  0x2e   :  { %602 = vmatpush.msrb.mxu2 %v1617_v35 }
  0x2f   :  { %665 = vmatpush.msra.mxu0 %v1579_v5 }
  0x30   :  { %603 = vmatpush.msrb.mxu2 %v1622_v36 }
  0x32   :  { %604 = vmatpush.msrb.mxu2 %v1627_v37 }
  0x34   :  { %605 = vmatpush.msrb.mxu2 %v1632_v38 }
  0x36   :  { %606 = vmatpush.msrb.mxu2 %v1642_v41 }
  0x93   :  { %v127_v8 = vpop.f32.mrf.mxu0 }
  0x94   :  { %v1597_v9 = vadd.f32 %v1253_v7, %v127_v8 }
  0x98   :  { %v151_v10 = vpop.f32.mrf.mxu1 }
  0x99   :  { %v154_v11 = vadd.f32 %v151_v10, %v1597_v9 }
  0x9b   :  { %1255 = vtanh.f32 %v154_v11  ;;  %v1211_v13 = vmul.f32 -1.442695, %v154_v11 }
  0x9d   :  { %1257 = vpow2.f32 %v1211_v13 }
  0xa1   :  { %v1256_v12 = vpop.eup %1255 }
  0xa2   :  { %177 = vrot.lane.b32.xlu0 %v1256_v12, %s1519_s17 }
  0xa3   :  { %v1258_v14 = vpop.eup %1257 }
  0xa4   :  { %v158_v15 = vadd.f32 1.0, %v1258_v14 }
  0xa6   :  { %1259 = vrcp.f32 %v158_v15  ;;  %v170_v21 = vand.u32 2147483648, %v158_v15  ;;  %vm164_vm3 = vweird.f32 %v158_v15  ;;  %v168_v22 = vand.u32 2147483647, %v158_v15 }
  0xa8   :  { %v171_v24 = vor.u32 1.1754944e-38, %v170_v21  ;;  %vm169_vm5 = vcmp.eq.f32.partialorder %v168_v22, 8.507059e+37 }
  0xac   :  { %v1260_v16 = vpop.eup %1259 }
  0xad   :  { %v160_v17 = vmul.f32 %v1260_v16, %v158_v15  ;;  %vm165_vm2 = vweird.f32 %v1260_v16 }
  0xae   :  { %vm166_vm4 = vmor %vm164_vm3, %vm165_vm2 }
  0xaf   :  { %v161_v18 = vsub.f32 1.0, %v160_v17 }
  0xb1   :  { %v162_v19 = vmul.f32 %v1260_v16, %v161_v18 }
  0xb3   :  { %v163_v20 = vadd.f32 %v1260_v16, %v162_v19 }
  0xb5   :  { %v167_v23 = vsel %vm166_vm4, %v1260_v16, %v163_v20 }
  0xb6   :  { %v172_v26 = vsel %vm169_vm5, %v171_v24, %v167_v23 }
  0xb7   :  { %v175_v28 = vmul.f32 0.0, %v172_v26 }
 0x114   :  { %v178_v25 = vpop.permute.xlu0 %177 }
 0x115   :  { %v180_v27 = vmul.f32 %v178_v25, %v172_v26 }
 0x117   :  { %182 = vrot.lane.b32.xlu0 %v180_v27, %s1520_s3 }
 0x189   :  { %v183_v29 = vpop.permute.xlu0 %182 }
 0x18a   :  { %v1602_v30 = vadd.f32 %v183_v29, %v175_v28 }
 0x18c   :  { %1261 = vtanh.f32 %v1602_v30 }
 0x192   :  { %v1262_v31 = vpop.eup %1261 }
 0x193   :  { %188 = vrot.lane.b32.xlu1 %v1262_v31, %s1519_s17 }
 0x205   :  { %v189_v39 = vpop.permute.xlu1 %188 }
 0x206   :  { %v191_v40 = vmul.f32 %v189_v39, %v172_v26 }
 0x208   :  { %193 = vrot.lane.b32.xlu1 %v191_v40, %s1520_s3 }
 0x27a   :  { %v194_v42 = vpop.permute.xlu1 %193 }
 0x27b   :  { %1214 = vmatmul.msk.f32.vlgmr.msra.gmra.mxu3 %vm130_vm6, %v194_v42  ;;  %v196_v43 = vsel %vm130_vm6, %v194_v42, 0.0 }
 0x27c   :  { %1212 = vmatmul.msk.f32.vlgmr.msra.gmra.mxu2 %vm200_vm7, %v196_v43  ;;  %791 = vmatpush.msra.mxu3 %v1570_v0 }
 0x27d   :  { %1115 = vmatpush.msra.mxu2 %v1606_v32 }
 0x27e   :  { %792 = vmatpush.msra.mxu3 %v1572_v1 }
 0x27f   :  { %1116 = vmatpush.msra.mxu2 %v1608_v33 }
 0x280   :  { %793 = vmatpush.msra.mxu3 %v1575_v4 }
 0x281   :  { %1117 = vmatpush.msra.mxu2 %v1612_v34 }
 0x282   :  { %794 = vmatpush.msra.mxu3 %v1579_v5 }
 0x283   :  { %1118 = vmatpush.msra.mxu2 %v1617_v35 }
 0x285   :  { %1119 = vmatpush.msra.mxu2 %v1622_v36 }
 0x287   :  { %1120 = vmatpush.msra.mxu2 %v1627_v37 }
 0x289   :  { %1121 = vmatpush.msra.mxu2 %v1632_v38 }
 0x28b   :  { %1122 = vmatpush.msra.mxu2 %v1642_v41 }
 0x2fe   :  { %v280_v47 = vpop.f32.mrf.mxu3 }
 0x2ff   :  { %v221_v45 = vpop.f32.mrf.mxu2  ;;  %v283_v48 = vadd.f32 %v280_v47, %v1597_v9 }
 0x300   :  { %v222_v46 = vadd.f32 %v1677_v44, %v221_v45 }
 0x301   :  { %v1215_v52 = vmul.f32 -1.442695, %v283_v48 }
 0x302   :  { %1263 = vtanh.f32 %v222_v46  ;;  %v1213_v51 = vmul.f32 -1.442695, %v222_v46 }
 0x303   :  { %1265 = vtanh.f32 %v283_v48 }
 0x304   :  { %1267 = vpow2.f32 %v1213_v51 }
 0x305   :  { %1269 = vpow2.f32 %v1215_v52 }
 0x308   :  { %v1264_v49 = vpop.eup %1263 }
 0x309   :  { %246 = vrot.lane.b32.xlu2 %v1264_v49, %s1519_s17  ;;  %v1266_v50 = vpop.eup %1265 }
 0x30a   :  { %v1268_v53 = vpop.eup %1267 }
 0x30b   :  { %v227_v54 = vadd.f32 1.0, %v1268_v53  ;;  %v1270_v55 = vpop.eup %1269 }
 0x30c   :  { %v287_v56 = vadd.f32 1.0, %v1270_v55 }
 0x30d   :  { %1271 = vrcp.f32 %v227_v54  ;;  %v239_v3 = vand.u32 2147483648, %v227_v54  ;;  %vm233_vm9 = vweird.f32 %v227_v54  ;;  %v237_v6 = vand.u32 2147483647, %v227_v54 }
 0x30e   :  { %1273 = vrcp.f32 %v287_v56  ;;  %v299_v15 = vand.u32 2147483648, %v287_v56  ;;  %vm293_vm13 = vweird.f32 %v287_v56  ;;  %v297_v16 = vand.u32 2147483647, %v287_v56 }
 0x30f   :  { %v240_v10 = vor.u32 1.1754944e-38, %v239_v3  ;;  %vm238_vm11 = vcmp.eq.f32.partialorder %v237_v6, 8.507059e+37 }
 0x310   :  { %v300_v18 = vor.u32 1.1754944e-38, %v299_v15  ;;  %vm298_vm15 = vcmp.eq.f32.partialorder %v297_v16, 8.507059e+37 }
 0x311   :  { %306 = vrot.lane.b32.xlu2 %v1266_v50, %s1519_s17 }
 0x313   :  { %v1272_v57 = vpop.eup %1271 }
 0x314   :  { %v229_v58 = vmul.f32 %v1272_v57, %v227_v54  ;;  %v1274_v60 = vpop.eup %1273  ;;  %vm234_vm8 = vweird.f32 %v1272_v57 }
 0x315   :  { %v289_v62 = vmul.f32 %v1274_v60, %v287_v56  ;;  %vm235_vm10 = vmor %vm233_vm9, %vm234_vm8  ;;  %vm294_vm12 = vweird.f32 %v1274_v60 }
 0x316   :  { %v230_v59 = vsub.f32 1.0, %v229_v58  ;;  %vm295_vm14 = vmor %vm293_vm13, %vm294_vm12 }
 0x317   :  { %v290_v2 = vsub.f32 1.0, %v289_v62 }
 0x318   :  { %v231_v61 = vmul.f32 %v1272_v57, %v230_v59 }
 0x319   :  { %v291_v8 = vmul.f32 %v1274_v60, %v290_v2 }
 0x31a   :  { %v232_v63 = vadd.f32 %v1272_v57, %v231_v61 }
 0x31b   :  { %v292_v14 = vadd.f32 %v1274_v60, %v291_v8 }
 0x31c   :  { %v236_v7 = vsel %vm235_vm10, %v1272_v57, %v232_v63 }
 0x31d   :  { %v241_v12 = vsel %vm238_vm11, %v240_v10, %v236_v7  ;;  %v296_v17 = vsel %vm295_vm14, %v1274_v60, %v292_v14 }
 0x31e   :  { %v301_v19 = vsel %vm298_vm15, %v300_v18, %v296_v17  ;;  %v244_v22 = vmul.f32 0.0, %v241_v12 }
 0x31f   :  { %v304_v25 = vmul.f32 %v301_v19, %v1602_v30 }
 0x363   :  { %v247_v11 = vpop.permute.xlu2 %246 }
 0x364   :  { %v249_v13 = vmul.f32 %v247_v11, %v241_v12 }
 0x366   :  { %251 = vrot.lane.b32.xlu0 %v249_v13, %s1520_s3 }
 0x36b   :  { %v307_v20 = vpop.permute.xlu2 %306 }
 0x36c   :  { %v309_v21 = vmul.f32 %v307_v20, %v301_v19 }
 0x36e   :  { %311 = vrot.lane.b32.xlu1 %v309_v21, %s1520_s3 }
 0x3d8   :  { %v252_v23 = vpop.permute.xlu0 %251 }
 0x3d9   :  { %v1685_v24 = vadd.f32 %v252_v23, %v244_v22 }
 0x3db   :  { %1275 = vtanh.f32 %v1685_v24 }
 0x3e0   :  { %v312_v26 = vpop.permute.xlu1 %311 }
 0x3e1   :  { %v1276_v27 = vpop.eup %1275  ;;  %v1689_v28 = vadd.f32 %v312_v26, %v304_v25 }
 0x3e2   :  { %257 = vrot.lane.b32.xlu2 %v1276_v27, %s1519_s17 }
 0x3e3   :  { %1277 = vtanh.f32 %v1689_v28 }
 0x3e9   :  { %v1278_v29 = vpop.eup %1277 }
 0x3ea   :  { %317 = vrot.lane.b32.xlu0 %v1278_v29, %s1519_s17 }
 0x43c   :  { %v258_v31 = vpop.permute.xlu2 %257 }
 0x43d   :  { %v1694_v39 = vmul.f32 %v258_v31, %v241_v12 }
 0x43f   :  { %326 = vrot.lane.b32.xlu2 %v1694_v39, %s1519_s17 }
 0x45c   :  { %v318_v40 = vpop.permute.xlu0 %317 }
 0x45d   :  { %v320_v42 = vmul.f32 %v318_v40, %v301_v19 }
 0x45f   :  { %322 = vrot.lane.b32.xlu1 %v320_v42, %s1520_s3 }
 0x499   :  { %v327_v30 = vpop.permute.xlu2 %326 }
 0x4d1   :  { %v323_v43 = vpop.permute.xlu1 %322 }
 0x4d2   :  { %v329_v45 = vsel %vm130_vm6, %v323_v43, %v327_v30  ;;  %1218 = vmatmul.msk.f32.vlgmr.msrb.gmra.mxu1 %vm130_vm6, %v323_v43 }
 0x4d3   :  { %1216 = vmatmul.msk.f32.vlgmr.msrb.gmra.mxu0 %vm200_vm7, %v329_v45  ;;  %728 = vmatpush.msrb.mxu1 %v1606_v32 }
 0x4d4   :  { %857 = vmatpush.msrb.mxu0 %v1606_v32 }
 0x4d5   :  { %729 = vmatpush.msrb.mxu1 %v1608_v33 }
 0x4d6   :  { %858 = vmatpush.msrb.mxu0 %v1608_v33 }
 0x4d7   :  { %730 = vmatpush.msrb.mxu1 %v1612_v34 }
 0x4d8   :  { %859 = vmatpush.msrb.mxu0 %v1612_v34 }
 0x4d9   :  { %731 = vmatpush.msrb.mxu1 %v1617_v35 }
 0x4da   :  { %860 = vmatpush.msrb.mxu0 %v1617_v35 }
 0x4db   :  { %732 = vmatpush.msrb.mxu1 %v1622_v36 }
 0x4dc   :  { %861 = vmatpush.msrb.mxu0 %v1622_v36 }
 0x4dd   :  { %733 = vmatpush.msrb.mxu1 %v1627_v37 }
 0x4de   :  { %862 = vmatpush.msrb.mxu0 %v1627_v37 }
 0x4df   :  { %734 = vmatpush.msrb.mxu1 %v1632_v38 }
 0x4e0   :  { %863 = vmatpush.msrb.mxu0 %v1632_v38 }
 0x4e1   :  { %735 = vmatpush.msrb.mxu1 %v1642_v41 }
 0x4e2   :  { %864 = vmatpush.msrb.mxu0 %v1642_v41 }
 0x54f   :  { %v409_v46 = vpop.f32.mrf.mxu1 }
 0x550   :  { %v412_v47 = vadd.f32 %v409_v46, %v1597_v9  ;;  %v350_v48 = vpop.f32.mrf.mxu0 }
 0x551   :  { %v351_v49 = vadd.f32 %v1677_v44, %v350_v48 }
 0x552   :  { %1279 = vtanh.f32 %v412_v47  ;;  %v1219_v52 = vmul.f32 -1.442695, %v412_v47 }
 0x553   :  { %1281 = vtanh.f32 %v351_v49  ;;  %v1217_v53 = vmul.f32 -1.442695, %v351_v49 }
 0x554   :  { %1283 = vpow2.f32 %v1219_v52 }
 0x555   :  { %1285 = vpow2.f32 %v1217_v53 }
 0x558   :  { %v1280_v50 = vpop.eup %1279 }
 0x559   :  { %v1282_v51 = vpop.eup %1281  ;;  %435 = vrot.lane.b32.xlu1 %v1280_v50, %s1519_s17 }
 0x55a   :  { %375 = vrot.lane.b32.xlu0 %v1282_v51, %s1519_s17  ;;  %v1284_v54 = vpop.eup %1283 }
 0x55b   :  { %v1286_v55 = vpop.eup %1285  ;;  %v416_v56 = vadd.f32 1.0, %v1284_v54 }
 0x55c   :  { %v356_v57 = vadd.f32 1.0, %v1286_v55 }
 0x55d   :  { %1287 = vrcp.f32 %v416_v56  ;;  %v428_v7 = vand.u32 2147483648, %v416_v56  ;;  %vm422_vm2 = vweird.f32 %v416_v56  ;;  %v426_v10 = vand.u32 2147483647, %v416_v56 }
 0x55e   :  { %1289 = vrcp.f32 %v356_v57  ;;  %v368_v11 = vand.u32 2147483648, %v356_v57  ;;  %vm362_vm4 = vweird.f32 %v356_v57  ;;  %v366_v12 = vand.u32 2147483647, %v356_v57 }
 0x55f   :  { %v429_v14 = vor.u32 1.1754944e-38, %v428_v7  ;;  %vm427_vm8 = vcmp.eq.f32.partialorder %v426_v10, 8.507059e+37 }
 0x560   :  { %v369_v16 = vor.u32 1.1754944e-38, %v368_v11  ;;  %vm367_vm9 = vcmp.eq.f32.partialorder %v366_v12, 8.507059e+37 }
 0x563   :  { %v1288_v58 = vpop.eup %1287 }
 0x564   :  { %v1290_v59 = vpop.eup %1289  ;;  %v418_v60 = vmul.f32 %v1288_v58, %v416_v56  ;;  %vm423_vm0 = vweird.f32 %v1288_v58 }
 0x565   :  { %v358_v61 = vmul.f32 %v1290_v59, %v356_v57  ;;  %vm363_vm1 = vweird.f32 %v1290_v59  ;;  %vm424_vm3 = vmor %vm422_vm2, %vm423_vm0 }
 0x566   :  { %v419_v62 = vsub.f32 1.0, %v418_v60  ;;  %vm364_vm5 = vmor %vm362_vm4, %vm363_vm1 }
 0x567   :  { %v359_v63 = vsub.f32 1.0, %v358_v61 }
 0x568   :  { %v420_v2 = vmul.f32 %v1288_v58, %v419_v62 }
 0x569   :  { %v360_v3 = vmul.f32 %v1290_v59, %v359_v63 }
 0x56a   :  { %v421_v6 = vadd.f32 %v1288_v58, %v420_v2 }
 0x56b   :  { %v361_v8 = vadd.f32 %v1290_v59, %v360_v3 }
 0x56c   :  { %v425_v13 = vsel %vm424_vm3, %v1288_v58, %v421_v6 }
 0x56d   :  { %v365_v15 = vsel %vm364_vm5, %v1290_v59, %v361_v8  ;;  %v430_v18 = vsel %vm427_vm8, %v429_v14, %v425_v13 }
 0x56e   :  { %v370_v21 = vsel %vm367_vm9, %v369_v16, %v365_v15  ;;  %v433_v29 = vmul.f32 %v430_v18, %v1689_v28 }
 0x56f   :  { %v373_v23 = vmul.f32 %v370_v21, %v1685_v24 }
 0x5cb   :  { %v436_v17 = vpop.permute.xlu1 %435 }
 0x5cc   :  { %v438_v19 = vmul.f32 %v436_v17, %v430_v18  ;;  %v376_v20 = vpop.permute.xlu0 %375 }
 0x5cd   :  { %v378_v22 = vmul.f32 %v376_v20, %v370_v21 }
 0x5ce   :  { %440 = vrot.lane.b32.xlu0 %v438_v19, %s1520_s3 }
 0x5cf   :  { %380 = vrot.lane.b32.xlu2 %v378_v22, %s1520_s3 }
 0x629   :  { %v381_v25 = vpop.permute.xlu2 %380 }
 0x62a   :  { %v1725_v26 = vadd.f32 %v381_v25, %v373_v23 }
 0x62c   :  { %1291 = vtanh.f32 %v1725_v26 }
 0x632   :  { %v1292_v27 = vpop.eup %1291 }
 0x633   :  { %386 = vrot.lane.b32.xlu1 %v1292_v27, %s1519_s17 }
 0x640   :  { %v441_v31 = vpop.permute.xlu0 %440 }
 0x641   :  { %v1730_v40 = vadd.f32 %v441_v31, %v433_v29 }
 0x643   :  { %1293 = vtanh.f32 %v1730_v40 }
 0x649   :  { %v1294_v42 = vpop.eup %1293 }
 0x64a   :  { %446 = vrot.lane.b32.xlu2 %v1294_v42, %s1519_s17 }
 0x6a4   :  { %v447_v30 = vpop.permute.xlu2 %446 }
 0x6a5   :  { %v449_v24 = vmul.f32 %v447_v30, %v430_v18  ;;  %v387_v43 = vpop.permute.xlu1 %386 }
 0x6a6   :  { %v389_v45 = vmul.f32 %v387_v43, %v370_v21 }
 0x6a7   :  { %451 = vrot.lane.b32.xlu0 %v449_v24, %s1520_s3 }
 0x6a8   :  { %455 = vrot.lane.b32.xlu1 %v389_v45, %s1519_s17 }
 0x719   :  { %v452_v46 = vpop.permute.xlu0 %451 }
 0x71a   :  { %1222 = vmatmul.msk.f32.vlgmr.msra.gmra.mxu1 %vm130_vm6, %v452_v46  ;;  %v1737_v28 = vpop.permute.xlu1 %455 }
 0x71b   :  { %v458_v47 = vsel %vm130_vm6, %v452_v46, %v1737_v28  ;;  %1049 = vmatpush.msra.mxu1 %v1570_v0 }
 0x71c   :  { %1220 = vmatmul.msk.f32.vlgmr.msrb.gmra.mxu3 %vm200_vm7, %v458_v47 }
 0x71d   :  { %1050 = vmatpush.msra.mxu1 %v1572_v1  ;;  %986 = vmatpush.msrb.mxu3 %v1606_v32 }
 0x71f   :  { %1051 = vmatpush.msra.mxu1 %v1575_v4  ;;  %987 = vmatpush.msrb.mxu3 %v1608_v33 }
 0x721   :  { %1052 = vmatpush.msra.mxu1 %v1579_v5  ;;  %988 = vmatpush.msrb.mxu3 %v1612_v34 }
 0x723   :  { %989 = vmatpush.msrb.mxu3 %v1617_v35 }
 0x725   :  { %990 = vmatpush.msrb.mxu3 %v1622_v36 }
 0x727   :  { %991 = vmatpush.msrb.mxu3 %v1627_v37 }
 0x729   :  { %992 = vmatpush.msrb.mxu3 %v1632_v38 }
 0x72b   :  { %993 = vmatpush.msrb.mxu3 %v1642_v41 }
 0x797   :  { %v538_v48 = vpop.f32.mrf.mxu1 }
 0x798   :  { %v541_v32 = vadd.f32 %v538_v48, %v1597_v9 }
 0x79a   :  { %1295 = vtanh.f32 %v541_v32  ;;  %v1223_v38 = vmul.f32 -1.442695, %v541_v32 }
 0x79f   :  { %v479_v49 = vpop.f32.mrf.mxu3 }
 0x7a0   :  { %v1296_v33 = vpop.eup %1295  ;;  %v480_v50 = vadd.f32 %v1677_v44, %v479_v49 }
 0x7a1   :  { %564 = vrot.lane.b32.xlu0 %v1296_v33, %s1519_s17 }
 0x7a2   :  { %1297 = vtanh.f32 %v480_v50  ;;  %v1221_v35 = vmul.f32 -1.442695, %v480_v50 }
 0x7a4   :  { %1299 = vpow2.f32 %v1221_v35 }
 0x7a8   :  { %v1298_v34 = vpop.eup %1297 }
 0x7a9   :  { %504 = vrot.lane.b32.xlu2 %v1298_v34, %s1519_s17 }
 0x7aa   :  { %v1300_v36 = vpop.eup %1299 }
 0x7ab   :  { %v485_v37 = vadd.f32 1.0, %v1300_v36 }
 0x7ad   :  { %1301 = vrcp.f32 %v485_v37  ;;  %v497_v58 = vand.u32 2147483648, %v485_v37  ;;  %vm491_vm11 = vweird.f32 %v485_v37  ;;  %v495_v59 = vand.u32 2147483647, %v485_v37 }
 0x7ae   :  { %1303 = vpow2.f32 %v1223_v38 }
 0x7af   :  { %v498_v62 = vor.u32 1.1754944e-38, %v497_v58  ;;  %vm496_vm13 = vcmp.eq.f32.partialorder %v495_v59, 8.507059e+37 }
 0x7b3   :  { %v1302_v41 = vpop.eup %1301 }
 0x7b4   :  { %v1304_v51 = vpop.eup %1303  ;;  %v487_v52 = vmul.f32 %v1302_v41, %v485_v37  ;;  %vm492_vm10 = vweird.f32 %v1302_v41 }
 0x7b5   :  { %v545_v53 = vadd.f32 1.0, %v1304_v51  ;;  %vm493_vm12 = vmor %vm491_vm11, %vm492_vm10 }
 0x7b6   :  { %v488_v54 = vsub.f32 1.0, %v487_v52 }
 0x7b7   :  { %1305 = vrcp.f32 %v545_v53  ;;  %v557_v10 = vand.u32 2147483648, %v545_v53  ;;  %vm551_vm15 = vweird.f32 %v545_v53  ;;  %v555_v11 = vand.u32 2147483647, %v545_v53 }
 0x7b8   :  { %v489_v55 = vmul.f32 %v1302_v41, %v488_v54 }
 0x7b9   :  { %v558_v13 = vor.u32 1.1754944e-38, %v557_v10  ;;  %vm556_vm1 = vcmp.eq.f32.partialorder %v555_v11, 8.507059e+37 }
 0x7ba   :  { %v490_v56 = vadd.f32 %v1302_v41, %v489_v55 }
 0x7bc   :  { %v494_v60 = vsel %vm493_vm12, %v1302_v41, %v490_v56 }
 0x7bd   :  { %v1306_v57 = vpop.eup %1305  ;;  %v499_v2 = vsel %vm496_vm13, %v498_v62, %v494_v60 }
 0x7be   :  { %v547_v61 = vmul.f32 %v1306_v57, %v545_v53  ;;  %vm552_vm14 = vweird.f32 %v1306_v57  ;;  %v502_v20 = vmul.f32 %v499_v2, %v1725_v26 }
 0x7bf   :  { %vm553_vm0 = vmor %vm551_vm15, %vm552_vm14 }
 0x7c0   :  { %v548_v6 = vsub.f32 1.0, %v547_v61 }
 0x7c2   :  { %v549_v7 = vmul.f32 %v1306_v57, %v548_v6 }
 0x7c4   :  { %v550_v8 = vadd.f32 %v1306_v57, %v549_v7 }
 0x7c6   :  { %v554_v12 = vsel %vm553_vm0, %v1306_v57, %v550_v8 }
 0x7c7   :  { %v559_v15 = vsel %vm556_vm1, %v558_v13, %v554_v12 }
 0x7c8   :  { %v562_v17 = vmul.f32 %v559_v15, %v1730_v40 }
 0x803   :  { %v505_v63 = vpop.permute.xlu2 %504 }
 0x804   :  { %v507_v3 = vmul.f32 %v505_v63, %v499_v2 }
 0x806   :  { %509 = vrot.lane.b32.xlu1 %v507_v3, %s1520_s3 }
 0x813   :  { %v565_v14 = vpop.permute.xlu0 %564 }
 0x814   :  { %v567_v16 = vmul.f32 %v565_v14, %v559_v15 }
 0x816   :  { %569 = vrot.lane.b32.xlu2 %v567_v16, %s1520_s3 }
 0x870   :  { %v570_v18 = vpop.permute.xlu2 %569 }
 0x871   :  { %v1761_v19 = vadd.f32 %v570_v18, %v562_v17 }
 0x873   :  { %1307 = vtanh.f32 %v1761_v19 }
 0x878   :  { %v510_v21 = vpop.permute.xlu1 %509 }
 0x879   :  { %v1308_v22 = vpop.eup %1307  ;;  %v1765_v23 = vadd.f32 %v510_v21, %v502_v20 }
 0x87a   :  { %575 = vrot.lane.b32.xlu1 %v1308_v22, %s1519_s17 }
 0x87b   :  { %1309 = vtanh.f32 %v1765_v23 }
 0x881   :  { %v1310_v25 = vpop.eup %1309 }
 0x882   :  { %515 = vrot.lane.b32.xlu0 %v1310_v25, %s1519_s17 }
 0x8ec   :  { %v576_v27 = vpop.permute.xlu1 %575 }
 0x8ed   :  { %v578_v29 = vmul.f32 %v576_v27, %v559_v15 }
 0x8ef   :  { %580 = vrot.lane.b32.xlu2 %v578_v29, %s1520_s3 }
 0x8f4   :  { %v516_v31 = vpop.permute.xlu0 %515 }
 0x8f5   :  { %v1771_v40 = vmul.f32 %v516_v31, %v499_v2 }
 0x8f7   :  { %584 = vrot.lane.b32.xlu0 %v1771_v40, %s1519_s17 }
 0x949   :  { %v581_v26 = vpop.permute.xlu2 %580 }
 0x94a   :  { %1226 = vmatmul.msk.f32.vlgmr.msra.gmra.mxu0 %vm130_vm6, %v581_v26 }
 0x94b   :  { %920 = vmatpush.msra.mxu0 %v1570_v0 }
 0x94d   :  { %921 = vmatpush.msra.mxu0 %v1572_v1 }
 0x94f   :  { %922 = vmatpush.msra.mxu0 %v1575_v4 }
 0x951   :  { %923 = vmatpush.msra.mxu0 %v1579_v5 }
 0x969   :  { %v585_v42 = vpop.permute.xlu0 %584 }
 0x96a   :  { %v587_v30 = vsel %vm130_vm6, %v581_v26, %v585_v42 }
 0x96b   :  { %1224 = vmatmul.msk.f32.vlgmr.msrb.gmra.mxu2 %vm200_vm7, %v587_v30 }
 0x9c7   :  { %v667_v24 = vpop.f32.mrf.mxu0 }
 0x9c8   :  { %v670_v43 = vadd.f32 %v667_v24, %v1597_v9 }
 0x9ca   :  { %1311 = vtanh.f32 %v670_v43  ;;  %v1227_v4 = vmul.f32 -1.442695, %v670_v43 }
 0x9d0   :  { %v1312_v45 = vpop.eup %1311 }
 0x9d1   :  { %693 = vrot.lane.b32.xlu1 %v1312_v45, %s1519_s17 }
 0x9ee   :  { %v608_v46 = vpop.f32.mrf.mxu2 }
 0x9ef   :  { %v609_v0 = vadd.f32 %v1677_v44, %v608_v46 }
 0x9f1   :  { %1313 = vtanh.f32 %v609_v0  ;;  %v1225_v48 = vmul.f32 -1.442695, %v609_v0 }
 0x9f2   :  { %1315 = vpow2.f32 %v1227_v4 }
 0x9f7   :  { %v1314_v1 = vpop.eup %1313 }
 0x9f8   :  { %633 = vrot.lane.b32.xlu2 %v1314_v1, %s1519_s17  ;;  %v1316_v5 = vpop.eup %1315 }
 0x9f9   :  { %v674_v47 = vadd.f32 1.0, %v1316_v5 }
 0x9fb   :  { %1317 = vrcp.f32 %v674_v47  ;;  %v686_v38 = vand.u32 2147483648, %v674_v47  ;;  %vm680_vm3 = vweird.f32 %v674_v47  ;;  %v684_v41 = vand.u32 2147483647, %v674_v47 }
 0x9fc   :  { %1319 = vpow2.f32 %v1225_v48 }
 0x9fd   :  { %v687_v53 = vor.u32 1.1754944e-38, %v686_v38  ;;  %vm685_vm5 = vcmp.eq.f32.partialorder %v684_v41, 8.507059e+37 }
 0xa01   :  { %v1318_v32 = vpop.eup %1317 }
 0xa02   :  { %v1320_v49 = vpop.eup %1319  ;;  %v676_v33 = vmul.f32 %v1318_v32, %v674_v47  ;;  %vm681_vm2 = vweird.f32 %v1318_v32 }
 0xa03   :  { %v614_v50 = vadd.f32 1.0, %v1320_v49  ;;  %vm682_vm4 = vmor %vm680_vm3, %vm681_vm2 }
 0xa04   :  { %v677_v34 = vsub.f32 1.0, %v676_v33 }
 0xa05   :  { %1321 = vrcp.f32 %v614_v50  ;;  %v626_v60 = vand.u32 2147483648, %v614_v50  ;;  %vm620_vm9 = vweird.f32 %v614_v50  ;;  %v624_v61 = vand.u32 2147483647, %v614_v50 }
 0xa06   :  { %v678_v35 = vmul.f32 %v1318_v32, %v677_v34 }
 0xa07   :  { %v627_v63 = vor.u32 1.1754944e-38, %v626_v60  ;;  %vm625_vm11 = vcmp.eq.f32.partialorder %v624_v61, 8.507059e+37 }
 0xa08   :  { %v679_v37 = vadd.f32 %v1318_v32, %v678_v35 }
 0xa0a   :  { %v683_v52 = vsel %vm682_vm4, %v1318_v32, %v679_v37 }
 0xa0b   :  { %v1322_v36 = vpop.eup %1321  ;;  %v688_v55 = vsel %vm685_vm5, %v687_v53, %v683_v52 }
 0xa0c   :  { %v616_v51 = vmul.f32 %v1322_v36, %v614_v50  ;;  %vm621_vm8 = vweird.f32 %v1322_v36  ;;  %v691_v7 = vmul.f32 %v688_v55, %v1761_v19 }
 0xa0d   :  { %vm622_vm10 = vmor %vm620_vm9, %vm621_vm8 }
 0xa0e   :  { %v617_v56 = vsub.f32 1.0, %v616_v51 }
 0xa10   :  { %v618_v58 = vmul.f32 %v1322_v36, %v617_v56 }
 0xa12   :  { %v619_v59 = vadd.f32 %v1322_v36, %v618_v58 }
 0xa14   :  { %v623_v62 = vsel %vm622_vm10, %v1322_v36, %v619_v59 }
 0xa15   :  { %v628_v3 = vsel %vm625_vm11, %v627_v63, %v623_v62 }
 0xa16   :  { %v631_v12 = vmul.f32 %v628_v3, %v1765_v23 }
 0xa43   :  { %v694_v54 = vpop.permute.xlu1 %693 }
 0xa44   :  { %v696_v57 = vmul.f32 %v694_v54, %v688_v55 }
 0xa46   :  { %698 = vrot.lane.b32.xlu0 %v696_v57, %s1520_s3 }
 0xa52   :  { %v634_v2 = vpop.permute.xlu2 %633 }
 0xa53   :  { %v636_v6 = vmul.f32 %v634_v2, %v628_v3 }
 0xa55   :  { %638 = vrot.lane.b32.xlu1 %v636_v6, %s1520_s3 }
 0xab8   :  { %v699_v8 = vpop.permute.xlu0 %698 }
 0xab9   :  { %v1789_v10 = vadd.f32 %v699_v8, %v691_v7 }
 0xabb   :  { %1323 = vtanh.f32 %v1789_v10 }
 0xac1   :  { %v1324_v11 = vpop.eup %1323 }
 0xac2   :  { %704 = vrot.lane.b32.xlu2 %v1324_v11, %s1519_s17 }
 0xac7   :  { %v639_v13 = vpop.permute.xlu1 %638 }
 0xac8   :  { %v1794_v14 = vadd.f32 %v639_v13, %v631_v12 }
 0xaca   :  { %1325 = vtanh.f32 %v1794_v14 }
 0xad0   :  { %v1326_v15 = vpop.eup %1325 }
 0xad1   :  { %644 = vrot.lane.b32.xlu0 %v1326_v15, %s1519_s17 }
 0xb1c   :  { %v705_v16 = vpop.permute.xlu2 %704 }
 0xb1d   :  { %v707_v17 = vmul.f32 %v705_v16, %v688_v55 }
 0xb1f   :  { %709 = vrot.lane.b32.xlu1 %v707_v17, %s1520_s3 }
 0xb43   :  { %v645_v18 = vpop.permute.xlu0 %644 }
 0xb44   :  { %v1799_v19 = vmul.f32 %v645_v18, %v628_v3 }
 0xb46   :  { %713 = vrot.lane.b32.xlu2 %v1799_v19, %s1519_s17 }
 0xb91   :  { %v710_v20 = vpop.permute.xlu1 %709 }
 0xb92   :  { %1230 = vmatmul.msk.f32.vlgmr.msra.gmra.mxu3 %vm130_vm6, %v710_v20 }
 0xba0   :  { %v714_v21 = vpop.permute.xlu2 %713 }
 0xba1   :  { %v716_v22 = vsel %vm130_vm6, %v710_v20, %v714_v21 }
 0xba2   :  { %1228 = vmatmul.msk.f32.vlgmr.msrb.gmra.mxu1 %vm200_vm7, %v716_v22 }
 0xc15   :  { %v796_v23 = vpop.f32.mrf.mxu3 }
 0xc16   :  { %v799_v25 = vadd.f32 %v796_v23, %v1597_v9 }
 0xc18   :  { %1327 = vtanh.f32 %v799_v25  ;;  %v1231_v42 = vmul.f32 -1.442695, %v799_v25 }
 0xc1e   :  { %v1328_v27 = vpop.eup %1327 }
 0xc1f   :  { %822 = vrot.lane.b32.xlu1 %v1328_v27, %s1519_s17  ;;  %v737_v29 = vpop.f32.mrf.mxu1 }
 0xc20   :  { %v738_v31 = vadd.f32 %v1677_v44, %v737_v29 }
 0xc22   :  { %1329 = vtanh.f32 %v738_v31  ;;  %v1229_v24 = vmul.f32 -1.442695, %v738_v31 }
 0xc23   :  { %1331 = vpow2.f32 %v1231_v42 }
 0xc24   :  { %1333 = vpow2.f32 %v1229_v24 }
 0xc28   :  { %v1330_v26 = vpop.eup %1329 }
 0xc29   :  { %762 = vrot.lane.b32.xlu0 %v1330_v26, %s1519_s17  ;;  %v1332_v30 = vpop.eup %1331 }
 0xc2a   :  { %v803_v43 = vadd.f32 1.0, %v1332_v30  ;;  %v1334_v45 = vpop.eup %1333 }
 0xc2b   :  { %v743_v0 = vadd.f32 1.0, %v1334_v45 }
 0xc2c   :  { %1335 = vrcp.f32 %v803_v43  ;;  %v815_v49 = vand.u32 2147483648, %v803_v43  ;;  %vm809_vm13 = vweird.f32 %v803_v43  ;;  %v813_v33 = vand.u32 2147483647, %v803_v43 }
 0xc2d   :  { %1337 = vrcp.f32 %v743_v0  ;;  %v755_v52 = vand.u32 2147483648, %v743_v0  ;;  %vm749_vm1 = vweird.f32 %v743_v0  ;;  %v753_v53 = vand.u32 2147483647, %v743_v0 }
 0xc2e   :  { %v816_v35 = vor.u32 1.1754944e-38, %v815_v49  ;;  %vm814_vm15 = vcmp.eq.f32.partialorder %v813_v33, 8.507059e+37 }
 0xc2f   :  { %v756_v55 = vor.u32 1.1754944e-38, %v755_v52  ;;  %vm754_vm3 = vcmp.eq.f32.partialorder %v753_v53, 8.507059e+37 }
 0xc32   :  { %v1336_v46 = vpop.eup %1335 }
 0xc33   :  { %v805_v1 = vmul.f32 %v1336_v46, %v803_v43  ;;  %v1338_v5 = vpop.eup %1337  ;;  %vm810_vm12 = vweird.f32 %v1336_v46 }
 0xc34   :  { %v745_v48 = vmul.f32 %v1338_v5, %v743_v0  ;;  %vm811_vm14 = vmor %vm809_vm13, %vm810_vm12  ;;  %vm750_vm0 = vweird.f32 %v1338_v5 }
 0xc35   :  { %v806_v4 = vsub.f32 1.0, %v805_v1  ;;  %vm751_vm2 = vmor %vm749_vm1, %vm750_vm0 }
 0xc36   :  { %v746_v50 = vsub.f32 1.0, %v745_v48 }
 0xc37   :  { %v807_v47 = vmul.f32 %v1336_v46, %v806_v4 }
 0xc38   :  { %v747_v36 = vmul.f32 %v1338_v5, %v746_v50 }
 0xc39   :  { %v808_v32 = vadd.f32 %v1336_v46, %v807_v47 }
 0xc3a   :  { %v748_v51 = vadd.f32 %v1338_v5, %v747_v36 }
 0xc3b   :  { %v812_v34 = vsel %vm811_vm14, %v1336_v46, %v808_v32 }
 0xc3c   :  { %v817_v38 = vsel %vm814_vm15, %v816_v35, %v812_v34  ;;  %v752_v54 = vsel %vm751_vm2, %v1338_v5, %v748_v51 }
 0xc3d   :  { %v757_v57 = vsel %vm754_vm3, %v756_v55, %v752_v54  ;;  %v820_v63 = vmul.f32 %v817_v38, %v1789_v10 }
 0xc3e   :  { %v760_v59 = vmul.f32 %v757_v57, %v1794_v14 }
 0xc91   :  { %v823_v37 = vpop.permute.xlu1 %822 }
 0xc92   :  { %v825_v41 = vmul.f32 %v823_v37, %v817_v38 }
 0xc94   :  { %827 = vrot.lane.b32.xlu0 %v825_v41, %s1520_s3 }
 0xc9b   :  { %v763_v56 = vpop.permute.xlu0 %762 }
 0xc9c   :  { %v765_v58 = vmul.f32 %v763_v56, %v757_v57 }
 0xc9e   :  { %767 = vrot.lane.b32.xlu2 %v765_v58, %s1520_s3 }
 0xcf8   :  { %v768_v60 = vpop.permute.xlu2 %767 }
 0xcf9   :  { %v1813_v61 = vadd.f32 %v768_v60, %v760_v59 }
 0xcfb   :  { %1339 = vtanh.f32 %v1813_v61 }
 0xd01   :  { %v1340_v62 = vpop.eup %1339 }
 0xd02   :  { %773 = vrot.lane.b32.xlu1 %v1340_v62, %s1519_s17 }
 0xd06   :  { %v828_v2 = vpop.permute.xlu0 %827 }
 0xd07   :  { %v1818_v3 = vadd.f32 %v828_v2, %v820_v63 }
 0xd09   :  { %1341 = vtanh.f32 %v1818_v3 }
 0xd0f   :  { %v1342_v6 = vpop.eup %1341 }
 0xd10   :  { %833 = vrot.lane.b32.xlu2 %v1342_v6, %s1519_s17 }
 0xd6a   :  { %v834_v7 = vpop.permute.xlu2 %833 }
 0xd6b   :  { %v836_v8 = vmul.f32 %v834_v7, %v817_v38 }
 0xd6d   :  { %838 = vrot.lane.b32.xlu0 %v836_v8, %s1520_s3 }
 0xd74   :  { %v774_v11 = vpop.permute.xlu1 %773 }
 0xd75   :  { %v1823_v12 = vmul.f32 %v774_v11, %v757_v57 }
 0xd77   :  { %842 = vrot.lane.b32.xlu1 %v1823_v12, %s1519_s17 }
 0xddf   :  { %v839_v13 = vpop.permute.xlu0 %838 }
 0xde9   :  { %v843_v10 = vpop.permute.xlu1 %842 }
 0xdea   :  { %v845_v14 = vsel %vm130_vm6, %v839_v13, %v843_v10 }
 0xdeb   :  { %1232 = vmatmul.msk.f32.vlgmr.msrb.gmra.mxu0 %vm200_vm7, %v845_v14 }
 0xdf3   :  { %1234 = vmatmul.msk.f32.vlgmr.msra.gmra.mxu0 %vm130_vm6, %v839_v13 }
 0xe68   :  { %v866_v15 = vpop.f32.mrf.mxu0 }
 0xe69   :  { %v867_v16 = vadd.f32 %v1677_v44, %v866_v15 }
 0xe6b   :  { %1343 = vtanh.f32 %v867_v16  ;;  %v1233_v22 = vmul.f32 -1.442695, %v867_v16 }
 0xe70   :  { %v925_v17 = vpop.f32.mrf.mxu0 }
 0xe71   :  { %v1344_v18 = vpop.eup %1343  ;;  %v928_v20 = vadd.f32 %v925_v17, %v1597_v9 }
 0xe72   :  { %891 = vrot.lane.b32.xlu2 %v1344_v18, %s1519_s17 }
 0xe73   :  { %1345 = vtanh.f32 %v928_v20  ;;  %v1235_v26 = vmul.f32 -1.442695, %v928_v20 }
 0xe74   :  { %1347 = vpow2.f32 %v1233_v22 }
 0xe79   :  { %v1346_v21 = vpop.eup %1345 }
 0xe7a   :  { %951 = vrot.lane.b32.xlu0 %v1346_v21, %s1519_s17  ;;  %v1348_v23 = vpop.eup %1347 }
 0xe7b   :  { %v872_v25 = vadd.f32 1.0, %v1348_v23 }
 0xe7d   :  { %1349 = vrcp.f32 %v872_v25  ;;  %v884_v24 = vand.u32 2147483648, %v872_v25  ;;  %vm878_vm5 = vweird.f32 %v872_v25  ;;  %v882_v43 = vand.u32 2147483647, %v872_v25 }
 0xe7e   :  { %1351 = vpow2.f32 %v1235_v26 }
 0xe7f   :  { %v885_v0 = vor.u32 1.1754944e-38, %v884_v24  ;;  %vm883_vm9 = vcmp.eq.f32.partialorder %v882_v43, 8.507059e+37 }
 0xe83   :  { %v1350_v27 = vpop.eup %1349 }
 0xe84   :  { %v874_v29 = vmul.f32 %v1350_v27, %v872_v25  ;;  %vm879_vm4 = vweird.f32 %v1350_v27  ;;  %v1352_v45 = vpop.eup %1351 }
 0xe85   :  { %vm880_vm8 = vmor %vm878_vm5, %vm879_vm4  ;;  %v932_v1 = vadd.f32 1.0, %v1352_v45 }
 0xe86   :  { %v875_v31 = vsub.f32 1.0, %v874_v29 }
 0xe87   :  { %1353 = vrcp.f32 %v932_v1  ;;  %v944_v34 = vand.u32 2147483648, %v932_v1  ;;  %vm938_vm11 = vweird.f32 %v932_v1  ;;  %v942_v35 = vand.u32 2147483647, %v932_v1 }
 0xe88   :  { %v876_v42 = vmul.f32 %v1350_v27, %v875_v31 }
 0xe89   :  { %v945_v37 = vor.u32 1.1754944e-38, %v944_v34  ;;  %vm943_vm13 = vcmp.eq.f32.partialorder %v942_v35, 8.507059e+37 }
 0xe8a   :  { %v877_v30 = vadd.f32 %v1350_v27, %v876_v42 }
 0xe8c   :  { %v881_v46 = vsel %vm880_vm8, %v1350_v27, %v877_v30 }
 0xe8d   :  { %v886_v5 = vsel %vm883_vm9, %v885_v0, %v881_v46  ;;  %v1354_v48 = vpop.eup %1353 }
 0xe8e   :  { %v934_v32 = vmul.f32 %v1354_v48, %v932_v1  ;;  %vm939_vm10 = vweird.f32 %v1354_v48  ;;  %v889_v52 = vmul.f32 %v886_v5, %v1813_v61 }
 0xe8f   :  { %vm940_vm12 = vmor %vm938_vm11, %vm939_vm10 }
 0xe90   :  { %v935_v49 = vsub.f32 1.0, %v934_v32 }
 0xe92   :  { %v936_v33 = vmul.f32 %v1354_v48, %v935_v49 }
 0xe94   :  { %v937_v50 = vadd.f32 %v1354_v48, %v936_v33 }
 0xe96   :  { %v941_v36 = vsel %vm940_vm12, %v1354_v48, %v937_v50  ;;  %vm1178_vm12 = vcmask 785408  }
 0xe97   :  { %v946_v41 = vsel %vm943_vm13, %v945_v37, %v941_v36  ;;  %vm1186_vm13 = vcmask 1041408  }
 0xe98   :  { %v949_v55 = vmul.f32 %v946_v41, %v1818_v3 }
 0xecc   :  { %v892_v4 = vpop.permute.xlu2 %891 }
 0xecd   :  { %v894_v47 = vmul.f32 %v892_v4, %v886_v5 }
 0xecf   :  { %896 = vrot.lane.b32.xlu1 %v894_v47, %s1520_s3 }
 0xeec   :  { %v952_v38 = vpop.permute.xlu0 %951 }
 0xeed   :  { %v954_v51 = vmul.f32 %v952_v38, %v946_v41 }
 0xeef   :  { %956 = vrot.lane.b32.xlu2 %v954_v51, %s1520_s3 }
 0xf41   :  { %v897_v53 = vpop.permute.xlu1 %896 }
 0xf42   :  { %v1837_v54 = vadd.f32 %v897_v53, %v889_v52 }
 0xf44   :  { %1355 = vtanh.f32 %v1837_v54 }
 0xf49   :  { %v957_v56 = vpop.permute.xlu2 %956 }
 0xf4a   :  { %v1356_v57 = vpop.eup %1355  ;;  %v1841_v58 = vadd.f32 %v957_v56, %v949_v55 }
 0xf4b   :  { %902 = vrot.lane.b32.xlu0 %v1356_v57, %s1519_s17 }
 0xf4c   :  { %1357 = vtanh.f32 %v1841_v58 }
 0xf52   :  { %v1358_v59 = vpop.eup %1357 }
 0xf53   :  { %962 = vrot.lane.b32.xlu1 %v1358_v59, %s1519_s17 }
 0xfbd   :  { %v903_v60 = vpop.permute.xlu0 %902 }
 0xfbe   :  { %v905_v61 = vmul.f32 %v903_v60, %v886_v5  ;;  %v1383_v60 = vld [vmem:[%s1894_s5] ss:$0 sm:$0xff]  ;;  %s1522_s5 = smov [#allocation10]  }
 0xfbf   :  { %s1195_s23 = sshll.u32 %s1522_s5, 4  ;;  %s1196_s23 = int_to_ptr.vmem [resolvable:$true] %s1195_s23 }
 0xfc0   :  { %971 = vrot.lane.b32.xlu0 %v905_v61, %s1519_s17 }
 0xfc5   :  { %v963_v62 = vpop.permute.xlu1 %962 }
 0xfc6   :  { %v965_v63 = vmul.f32 %v963_v62, %v946_v41 }
 0xfc8   :  { %967 = vrot.lane.b32.xlu2 %v965_v63, %s1520_s3 }
0x1022   :  { %v968_v2 = vpop.permute.xlu2 %967 }
0x1023   :  { %1238 = vmatmul.msk.f32.vlgmr.msra.gmra.mxu1 %vm130_vm6, %v968_v2 }
0x1032   :  { %v1849_v3 = vpop.permute.xlu0 %971 }
0x1033   :  { %v974_v6 = vsel %vm130_vm6, %v968_v2, %v1849_v3 }
0x1034   :  { %1236 = vmatmul.msk.f32.vlgmr.msrb.gmra.mxu3 %vm200_vm7, %v974_v6 }
0x10a0   :  { %v1054_v7 = vpop.f32.mrf.mxu1 }
0x10a1   :  { %v1057_v8 = vadd.f32 %v1054_v7, %v1597_v9 }
0x10a3   :  { %1359 = vtanh.f32 %v1057_v8  ;;  %v1239_v15 = vmul.f32 -1.442695, %v1057_v8 }
0x10a9   :  { %v1360_v11 = vpop.eup %1359 }
0x10aa   :  { %1080 = vrot.lane.b32.xlu2 %v1360_v11, %s1519_s17 }
0x10b7   :  { %v995_v13 = vpop.f32.mrf.mxu3 }
0x10b8   :  { %v996_v10 = vadd.f32 %v1677_v44, %v995_v13 }
0x10ba   :  { %1361 = vtanh.f32 %v996_v10  ;;  %v1237_v42 = vmul.f32 -1.442695, %v996_v10 }
0x10bb   :  { %1363 = vpow2.f32 %v1239_v15 }
0x10c0   :  { %v1362_v14 = vpop.eup %1361 }
0x10c1   :  { %1020 = vrot.lane.b32.xlu1 %v1362_v14, %s1519_s17  ;;  %v1364_v16 = vpop.eup %1363 }
0x10c2   :  { %v1061_v17 = vadd.f32 1.0, %v1364_v16 }
0x10c4   :  { %1365 = vrcp.f32 %v1061_v17  ;;  %v1073_v23 = vand.u32 2147483648, %v1061_v17  ;;  %vm1067_vm15 = vweird.f32 %v1061_v17  ;;  %v1071_v25 = vand.u32 2147483647, %v1061_v17 }
0x10c5   :  { %1367 = vpow2.f32 %v1237_v42 }
0x10c6   :  { %v1074_v27 = vor.u32 1.1754944e-38, %v1073_v23  ;;  %vm1072_vm1 = vcmp.eq.f32.partialorder %v1071_v25, 8.507059e+37 }
0x10ca   :  { %v1366_v18 = vpop.eup %1365 }
0x10cb   :  { %v1063_v20 = vmul.f32 %v1366_v18, %v1061_v17  ;;  %vm1068_vm14 = vweird.f32 %v1366_v18  ;;  %v1368_v30 = vpop.eup %1367 }
0x10cc   :  { %vm1069_vm0 = vmor %vm1067_vm15, %vm1068_vm14  ;;  %v1001_v24 = vadd.f32 1.0, %v1368_v30 }
0x10cd   :  { %v1064_v21 = vsub.f32 1.0, %v1063_v20 }
0x10ce   :  { %1369 = vrcp.f32 %v1001_v24  ;;  %v1013_v4 = vand.u32 2147483648, %v1001_v24  ;;  %vm1007_vm3 = vweird.f32 %v1001_v24  ;;  %v1011_v5 = vand.u32 2147483647, %v1001_v24 }
0x10cf   :  { %v1065_v9 = vmul.f32 %v1366_v18, %v1064_v21 }
0x10d0   :  { %v1014_v48 = vor.u32 1.1754944e-38, %v1013_v4  ;;  %vm1012_vm5 = vcmp.eq.f32.partialorder %v1011_v5, 8.507059e+37 }
0x10d1   :  { %v1066_v22 = vadd.f32 %v1366_v18, %v1065_v9 }
0x10d3   :  { %v1070_v44 = vsel %vm1069_vm0, %v1366_v18, %v1066_v22 }
0x10d4   :  { %v1075_v31 = vsel %vm1072_vm1, %v1074_v27, %v1070_v44  ;;  %v1370_v43 = vpop.eup %1369 }
0x10d5   :  { %v1003_v45 = vmul.f32 %v1370_v43, %v1001_v24  ;;  %vm1008_vm2 = vweird.f32 %v1370_v43  ;;  %v1078_v50 = vmul.f32 %v1075_v31, %v1841_v58 }
0x10d6   :  { %vm1009_vm4 = vmor %vm1007_vm3, %vm1008_vm2 }
0x10d7   :  { %v1004_v46 = vsub.f32 1.0, %v1003_v45 }
0x10d9   :  { %v1005_v0 = vmul.f32 %v1370_v43, %v1004_v46 }
0x10db   :  { %v1006_v1 = vadd.f32 %v1370_v43, %v1005_v0 }
0x10dd   :  { %v1010_v47 = vsel %vm1009_vm4, %v1370_v43, %v1006_v1 }
0x10de   :  { %v1015_v49 = vsel %vm1012_vm5, %v1014_v48, %v1010_v47 }
0x10df   :  { %v1018_v37 = vmul.f32 %v1015_v49, %v1837_v54 }
0x1104   :  { %v1081_v29 = vpop.permute.xlu2 %1080 }
0x1105   :  { %v1083_v26 = vmul.f32 %v1081_v29, %v1075_v31 }
0x1107   :  { %1085 = vrot.lane.b32.xlu1 %v1083_v26, %s1520_s3 }
0x1133   :  { %v1021_v32 = vpop.permute.xlu1 %1020 }
0x1134   :  { %v1023_v33 = vmul.f32 %v1021_v32, %v1015_v49 }
0x1136   :  { %1025 = vrot.lane.b32.xlu0 %v1023_v33, %s1520_s3 }
0x1179   :  { %v1086_v34 = vpop.permute.xlu1 %1085 }
0x117a   :  { %v1088_v35 = vadd.f32 %v1086_v34, %v1078_v50 }
0x117c   :  { %1371 = vtanh.f32 %v1088_v35 }
0x1182   :  { %v1372_v36 = vpop.eup %1371 }
0x1183   :  { %1091 = vrot.lane.b32.xlu0 %v1372_v36, %s1519_s17 }
0x11a8   :  { %v1026_v38 = vpop.permute.xlu0 %1025 }
0x11a9   :  { %v1028_v41 = vadd.f32 %v1026_v38, %v1018_v37 }
0x11ab   :  { %1373 = vtanh.f32 %v1028_v41 }
0x11b1   :  { %v1374_v51 = vpop.eup %1373 }
0x11b2   :  { %1031 = vrot.lane.b32.xlu2 %v1374_v51, %s1519_s17 }
0x11f5   :  { %v1092_v52 = vpop.permute.xlu0 %1091 }
0x11f6   :  { %v1094_v53 = vmul.f32 %v1092_v52, %v1075_v31 }
0x11f8   :  { %1096 = vrot.lane.b32.xlu1 %v1094_v53, %s1520_s3 }
0x120c   :  { %v1032_v55 = vpop.permute.xlu2 %1031 }
0x120d   :  { %v1034_v56 = vmul.f32 %v1032_v55, %v1015_v49 }
0x120f   :  { %1100 = vrot.lane.b32.xlu2 %v1034_v56, %s1519_s17 }
0x1269   :  { %v1101_v57 = vpop.permute.xlu2 %1100 }
0x126a   :  { %v1097_v58 = vpop.permute.xlu1 %1096 }
0x126b   :  { %v1103_v59 = vsel %vm130_vm6, %v1097_v58, %v1101_v57 }
0x126c   :  { %1240 = vmatmul.msk.f32.vlgmr.msra.gmra.mxu2 %vm200_vm7, %v1103_v59 }
0x12ef   :  { %v1124_v54 = vpop.f32.mrf.mxu2 }
0x12f0   :  { %v1125_v61 = vadd.f32 %v1383_v60, %v1124_v54 }
0x12f2   :  { %1375 = vtanh.f32 %v1125_v61  ;;  %v1241_v63 = vmul.f32 -1.442695, %v1125_v61 }
0x12f4   :  { %1377 = vpow2.f32 %v1241_v63 }
0x12f8   :  { %v1376_v62 = vpop.eup %1375 }
0x12f9   :  { %1149 = vrot.lane.b32.xlu0 %v1376_v62, %s1519_s17 }
0x12fa   :  { %v1378_v2 = vpop.eup %1377 }
0x12fb   :  { %v1130_v6 = vadd.f32 1.0, %v1378_v2 }
0x12fd   :  { %1379 = vrcp.f32 %v1130_v6  ;;  %v1142_v14 = vand.u32 2147483648, %v1130_v6  ;;  %vm1136_vm9 = vweird.f32 %v1130_v6  ;;  %v1140_v15 = vand.u32 2147483647, %v1130_v6 }
0x12ff   :  { %vm1141_vm11 = vcmp.eq.f32.partialorder %v1140_v15, 8.507059e+37 }
0x1301   :  { %1170 = vrot.lane.b32.xlu0 %v1823_v12, %s1520_s3  ;;  %v1143_v12 = vor.u32 1.1754944e-38, %v1142_v14 }
0x1303   :  { %v1380_v7 = vpop.eup %1379 }
0x1304   :  { %v1132_v8 = vmul.f32 %v1380_v7, %v1130_v6  ;;  %vm1137_vm8 = vweird.f32 %v1380_v7 }
0x1305   :  { %vm1138_vm10 = vmor %vm1136_vm9, %vm1137_vm8 }
0x1306   :  { %v1133_v11 = vsub.f32 1.0, %v1132_v8 }
0x1308   :  { %v1134_v13 = vmul.f32 %v1380_v7, %v1133_v11 }
0x1309   :  { %1167 = vrot.lane.b32.xlu0 %v1771_v40, %s1521_s22 }
0x130a   :  { %v1135_v10 = vadd.f32 %v1380_v7, %v1134_v13 }
0x130c   :  { %v1139_v16 = vsel %vm1138_vm10, %v1380_v7, %v1135_v10 }
0x130d   :  { %v1144_v40 = vsel %vm1141_vm11, %v1143_v12, %v1139_v16 }
0x130e   :  { %v1147_v20 = vmul.f32 %v1144_v40, %v1028_v41 }
0x136b   :  { %v1150_v17 = vpop.permute.xlu0 %1149 }
0x136c   :  { %v1152_v18 = vmul.f32 %v1150_v17, %v1144_v40 }
0x136e   :  { %1154 = vrot.lane.b32.xlu1 %v1152_v18, %s1520_s3 }
0x1373   :  { %v1171_v23 = vpop.permute.xlu0 %1170 }
0x1374   :  { %v1180_v29 = vsel %vm130_vm6, %v1171_v23, %v1849_v3 }
0x1376   :  { %1173 = vrot.lane.b32.xlu1 %v1034_v56, %s1521_s22 }
0x137b   :  { %v1168_v30 = vpop.permute.xlu0 %1167 }
0x13e0   :  { %v1155_v21 = vpop.permute.xlu1 %1154 }
0x13e1   :  { %v1157_v9 = vadd.f32 %v1155_v21, %v1147_v20 }
0x13e3   :  { %1381 = vtanh.f32 %v1157_v9 }
0x13e8   :  { %v1174_v44 = vpop.permute.xlu1 %1173 }
0x13e9   :  { %v1382_v22 = vpop.eup %1381  ;;  %v1181_v31 = vsel %vm200_vm7, %v1180_v29, %v1174_v44 }
0x13ea   :  { %1160 = vrot.lane.b32.xlu2 %v1382_v22, %s1519_s17 }
0x13f2   :  { %1164 = vrot.lane.b32.xlu2 %v1694_v39, %s1520_s3 }
0x1444   :  { %v1161_v25 = vpop.permute.xlu2 %1160 }
0x1445   :  { %v1163_v27 = vmul.f32 %v1161_v25, %v1144_v40 }
0x1447   :  { %v1182_v26 = vsel %vm1178_vm12, %v1181_v31, %v1163_v27 }
0x1448   :  { %v1185_v24 = vrot.slane %v1182_v26, 6 }
0x144c   :  { %v1165_v42 = vpop.permute.xlu2 %1164 }
0x144d   :  { %v1176_v39 = vsel %vm130_vm6, %v1165_v42, %v1737_v28 }
0x144e   :  { %v1177_v43 = vsel %vm200_vm7, %v1176_v39, %v1168_v30 }
0x144f   :  { %v1179_v3 = vsel %vm1178_vm12, %v1177_v43, %v1799_v19 }
0x1450   :  { %v1187_v45 = vsel %vm1186_vm13, %v1179_v3, %v1185_v24 }
0x1451   :  { %1189 = vst [vmem:[#allocation10] sm:$0xf] %v1187_v45 }
0x1452   :  { %1200 = dma.vmem_to_hbm [thread:$0]  %s1196_s23, 64, %s1198_s26, [#allocation4]  }
0x1453   :  { %1510 = dma.done.wait [#allocation4], 64  }
0x1454   :  { %1511 = vsyncadd [#allocation4], 4294967232 }
0x1455   :  { %1205 = vsyncpa [#allocation3], 1 }
0x1456   :  { %1206 = vsyncpa [#allocation6], 1 }
0x1457   :  { %1207 = vsyncpa [#allocation9], 1 }
0x1458   :  { %1208 = vsyncpa [#allocation4], 1 }

</bundles_post_ra>
